<compile_context>
chip_gen: v6e
topology: v6e:2x2x1
jax: 0.10.0
libtpu: 0.0.40
codegen_flags: <defaults>
</compile_context>

<pallas_src>
import jax
import jax.numpy as jnp
import numpy as np
from jax.experimental import pallas as pl
from jax.experimental.pallas import tpu as pltpu

# ----------------------------- model config ---------------------------------
B = 4
C, H, W = 4, 4, 4
INPUT_DIM = C * H * W          # 64
N_MLP = 3
CONVERT_DIM = 16
STYLE_DIM = 16
LATENT_DIM = 32
FINAL_DIMS = (80, 64, 80, 3, 27, 2, 1)   # concatenated -> 257
TOTAL_FINAL = sum(FINAL_DIMS)
TOTAL_PAD = 384                 # 257 padded up to a multiple of 128 (lane-dense store)
BN_EPS = 1e-5
PN_EPS = 1e-8
LRELU_SLOPE = 0.2
VEC_W = 128                     # packed bias/gamma/beta row width (one vreg)


def _linT(x, w):
    # y = x @ w.T  with w in PyTorch (out, in) layout
    return jax.lax.dot_general(
        x, w, (((1,), (1,)), ((), ())), preferred_element_type=jnp.float32
    )


def _leaky_relu(h):
    return jnp.where(h > 0, h, LRELU_SLOPE * h)


def _batch_norm(h, gamma, beta):
    # nn.BatchNorm1d training mode (biased variance), one-pass form:
    # the two sublane reductions (mean, mean of squares) are independent, and
    # gamma/beta are folded into a single scale/shift.
    m = jnp.mean(h, axis=0, keepdims=True)
    m2 = jnp.mean(h * h, axis=0, keepdims=True)
    s = gamma * jax.lax.rsqrt(m2 - m * m + BN_EPS)
    return h * s + (beta - m * s)


# ------------------------------ Pallas kernel --------------------------------
# Packed vector rows (vec_ref, shape (8, 128)):
#   0: [b_mu | b_var]                (32)
#   1: b_in                          (32)
#   2: g_in                          (32)
#   3: be_in                         (32)
#   4: b_cvt[0..2]  lane-concat      (48)
#   5: b_lin[0..2]  lane-concat      (96)
#   6: g_lin[0..2]  lane-concat      (96)
#   7: be_lin[0..2] lane-concat      (96)
def decoder_kernel(
    x_ref, xr_ref, eps_ref,
    w_muvar_ref, w_in_ref, w_cvt_ref, w_linb_ref, w_lin_a_ref,
    w_fin_a_ref, w_fin_b_ref, b_fin_ref, vec_ref,
    coeff_ref, muvar_ref,
):
    x = x_ref[...]           # (B, INPUT_DIM)
    xr = xr_ref[...]         # (B, INPUT_DIM)
    eps = eps_ref[...]       # (B, STYLE_DIM)

    # --- x-only final-head contribution: largest matmul, no latent dependency,
    #     issued first so the MXU work hides under the PixelNorm/BN chain. -------
    fin_x = _linT(x, w_fin_b_ref[...]) + b_fin_ref[...]                 # (B, 384)

    # --- all condition features + their per-block linear contribution (hoisted) -
    cond_all = _linT(x, w_cvt_ref[...]) + vec_ref[4:5, :N_MLP * CONVERT_DIM]
    pre_all = _linT(cond_all, w_linb_ref[...]) + vec_ref[5:6, :N_MLP * LATENT_DIM]

    # --- VAE reparametrization (mu / logvar fused into one matmul) --------------
    muvar = _linT(xr, w_muvar_ref[...]) + vec_ref[0:1, :2 * STYLE_DIM]  # (B, 32)
    muvar_ref[...] = muvar
    mu = muvar[:, :STYLE_DIM]
    logvar = muvar[:, STYLE_DIM:]
    style = eps * jnp.exp(0.5 * logvar) + mu

    # --- input_layer: PixelNorm -> Linear -> LeakyReLU -> BatchNorm1d ----------
    pn = style * jax.lax.rsqrt(
        jnp.mean(style * style, axis=1, keepdims=True) + PN_EPS
    )
    h = _linT(pn, w_in_ref[...]) + vec_ref[1:2, :LATENT_DIM]
    latent = _batch_norm(
        _leaky_relu(h), vec_ref[2:3, :LATENT_DIM], vec_ref[3:4, :LATENT_DIM]
    )

    # --- n_mlp conditioned blocks: only latent @ w_lin_a[i] stays serial --------
    for i in range(N_MLP):
        lo, hi = i * LATENT_DIM, (i + 1) * LATENT_DIM
        h = _linT(latent, w_lin_a_ref[i]) + pre_all[:, lo:hi]
        latent = _batch_norm(
            _leaky_relu(h), vec_ref[6:7, lo:hi], vec_ref[7:8, lo:hi]
        )

    # --- 7 final heads fused (row-concatenated, zero-padded to 384 lanes) -------
    coeff_ref[...] = fin_x + _linT(latent, w_fin_a_ref[...])


# ------------------------------- wrapper --------------------------------------
def _block_diag(blocks):
    rows = sum(b.shape[0] for b in blocks)
    cols = sum(b.shape[1] for b in blocks)
    out = jnp.zeros((rows, cols), blocks[0].dtype)
    r = c = 0
    for b in blocks:
        out = out.at[r:r + b.shape[0], c:c + b.shape[1]].set(b)
        r += b.shape[0]
        c += b.shape[1]
    return out


def decoder_forward(x, x_reverse, eps, params):
    b = x.shape[0]
    x_flat = x.reshape(b, -1).astype(jnp.float32)
    xr_flat = x_reverse.reshape(b, -1).astype(jnp.float32)

    # ---- parameter packing (pure layout plumbing, done in XLA) ----
    w_muvar = jnp.concatenate([params["w_mu"], params["w_var"]], axis=0)    # (32, 64)
    b_muvar = jnp.concatenate([params["b_mu"], params["b_var"]], axis=1)    # (1, 32)

    w_cvt_all = params["w_cvt"].reshape(N_MLP * CONVERT_DIM, INPUT_DIM)     # (48, 64)
    b_cvt_all = params["b_cvt"].reshape(1, N_MLP * CONVERT_DIM)             # (1, 48)

    # block-diagonal stack of the cond-half weights: (3L, 3Cv)
    w_linb_blk = _block_diag([params["w_lin_b"][i] for i in range(N_MLP)])  # (96, 48)
    b_lin_all = params["b_lin"].reshape(1, N_MLP * LATENT_DIM)              # (1, 96)
    g_lin_all = params["g_lin"].reshape(1, N_MLP * LATENT_DIM)
    be_lin_all = params["be_lin"].reshape(1, N_MLP * LATENT_DIM)

    def row(v):
        return jnp.pad(v, ((0, 0), (0, VEC_W - v.shape[1])))

    vecs = jnp.concatenate(
        [row(b_muvar), row(params["b_in"]), row(params["g_in"]), row(params["be_in"]),
         row(b_cvt_all), row(b_lin_all), row(g_lin_all), row(be_lin_all)],
        axis=0,
    )                                                                       # (8, 128)

    pad = TOTAL_PAD - TOTAL_FINAL
    w_fin_a = jnp.pad(params["w_fin_a"], ((0, pad), (0, 0)))                # (384, 32)
    w_fin_b = jnp.pad(params["w_fin_b"], ((0, pad), (0, 0)))                # (384, 64)
    b_fin = jnp.pad(params["b_fin"], ((0, 0), (0, pad)))                    # (1, 384)

    inputs = (
        x_flat, xr_flat, eps,
        w_muvar, params["w_in"], w_cvt_all, w_linb_blk, params["w_lin_a"],
        w_fin_a, w_fin_b, b_fin, vecs,
    )

    vmem = pl.BlockSpec(memory_space=pltpu.MemorySpace.VMEM)
    out_shape = (
        jax.ShapeDtypeStruct((b, TOTAL_PAD), jnp.float32),      # padded coeff_3dmm
        jax.ShapeDtypeStruct((b, 2 * STYLE_DIM), jnp.float32),  # [mu | logvar]
    )

    coeff_pad, muvar = pl.pallas_call(
        decoder_kernel,
        out_shape=out_shape,
        in_specs=[vmem] * len(inputs),
        out_specs=(vmem, vmem),
    )(*inputs)

    coeff = coeff_pad[:, :TOTAL_FINAL]
    mu = muvar[:, :STYLE_DIM]
    logvar = muvar[:, STYLE_DIM:]
    return coeff, mu, logvar


# ---------------------- deterministic parameter init --------------------------
def init_params(key):
    def linear(key, out_dim, in_dim):
        kw, kb = jax.random.split(key)
        bound = 1.0 / np.sqrt(in_dim)
        w = jax.random.uniform(kw, (out_dim, in_dim), jnp.float32, -bound, bound)
        bi = jax.random.uniform(kb, (1, out_dim), jnp.float32, -bound, bound)
        return w, bi

    keys = jax.random.split(key, 8)
    p = {}
    p["w_mu"], p["b_mu"] = linear(keys[0], STYLE_DIM, INPUT_DIM)
    p["w_var"], p["b_var"] = linear(keys[1], STYLE_DIM, INPUT_DIM)
    p["w_in"], p["b_in"] = linear(keys[2], LATENT_DIM, STYLE_DIM)
    p["g_in"] = jnp.ones((1, LATENT_DIM), jnp.float32)
    p["be_in"] = jnp.zeros((1, LATENT_DIM), jnp.float32)

    lin_ws, lin_bs, cvt_ws, cvt_bs = [], [], [], []
    lk = jax.random.split(keys[3], N_MLP)
    ck = jax.random.split(keys[4], N_MLP)
    for i in range(N_MLP):
        w, bi = linear(lk[i], LATENT_DIM, LATENT_DIM + CONVERT_DIM)
        lin_ws.append(w)
        lin_bs.append(bi)
        w, bi = linear(ck[i], CONVERT_DIM, INPUT_DIM)
        cvt_ws.append(w)
        cvt_bs.append(bi)
    w_lin = jnp.stack(lin_ws)                              # (n_mlp, L, L+Cv)
    p["w_lin_a"] = w_lin[:, :, :LATENT_DIM]                # (n_mlp, L, L)
    p["w_lin_b"] = w_lin[:, :, LATENT_DIM:]                # (n_mlp, L, Cv)
    p["b_lin"] = jnp.stack(lin_bs)                         # (n_mlp, 1, L)
    p["g_lin"] = jnp.ones((N_MLP, 1, LATENT_DIM), jnp.float32)
    p["be_lin"] = jnp.zeros((N_MLP, 1, LATENT_DIM), jnp.float32)
    p["w_cvt"] = jnp.stack(cvt_ws)                         # (n_mlp, Cv, In)
    p["b_cvt"] = jnp.stack(cvt_bs)                         # (n_mlp, 1, Cv)

    # Final heads are zero-initialized in the module; fuse into one weight matrix.
    p["w_fin_a"] = jnp.zeros((TOTAL_FINAL, LATENT_DIM), jnp.float32)
    p["w_fin_b"] = jnp.zeros((TOTAL_FINAL, INPUT_DIM), jnp.float32)
    p["b_fin"] = jnp.zeros((1, TOTAL_FINAL), jnp.float32)
    return p


# --------------------------- pure-JAX reference --------------------------------
def _batch_norm_ref(h, gamma, beta):
    mean = jnp.mean(h, axis=0, keepdims=True)
    var = jnp.mean((h - mean) * (h - mean), axis=0, keepdims=True)
    return (h - mean) * jax.lax.rsqrt(var + BN_EPS) * gamma + beta


def decoder_reference(x, x_reverse, eps, p):
    b = x.shape[0]
    xf = x.reshape(b, -1)
    xr = x_reverse.reshape(b, -1)
    mu = xr @ p["w_mu"].T + p["b_mu"]
    logvar = xr @ p["w_var"].T + p["b_var"]
    style = eps * jnp.exp(0.5 * logvar) + mu
    pn = style * jax.lax.rsqrt(jnp.mean(style**2, axis=1, keepdims=True) + PN_EPS)
    latent = _batch_norm_ref(_leaky_relu(pn @ p["w_in"].T + p["b_in"]),
                             p["g_in"], p["be_in"])
    for i in range(N_MLP):
        cond = xf @ p["w_cvt"][i].T + p["b_cvt"][i]
        z = jnp.concatenate([latent, cond], axis=1)
        w = jnp.concatenate([p["w_lin_a"][i], p["w_lin_b"][i]], axis=1)
        latent = _batch_norm_ref(_leaky_relu(z @ w.T + p["b_lin"][i]),
                                 p["g_lin"][i], p["be_lin"][i])
    zcat = jnp.concatenate([latent, xf], axis=1)
    wf = jnp.concatenate([p["w_fin_a"], p["w_fin_b"]], axis=1)
    coeff = zcat @ wf.T + p["b_fin"]
    return coeff, mu, logvar


# ----------------------------------- main --------------------------------------
if __name__ == "__main__":
    key = jax.random.PRNGKey(0)
    k_x, k_xr, k_eps, k_p = jax.random.split(key, 4)

    x = jax.random.normal(k_x, (B, C, H, W), jnp.float32)
    x_reverse = jax.random.normal(k_xr, (B, C, H, W), jnp.float32)
    # torch.randn_like(std) supplied externally for determinism
    eps = jax.random.normal(k_eps, (B, STYLE_DIM), jnp.float32)
    params = init_params(k_p)

    coeff, mu, logvar = decoder_forward(x, x_reverse, eps, params)
    jax.block_until_ready((coeff, mu, logvar))

    coeff_r, mu_r, logvar_r = decoder_reference(x, x_reverse, eps, params)
    assert coeff.shape == (B, TOTAL_FINAL)
    np.testing.assert_allclose(np.asarray(coeff), np.asarray(coeff_r), atol=1e-4, rtol=1e-4)
    np.testing.assert_allclose(np.asarray(mu), np.asarray(mu_r), atol=1e-4, rtol=1e-4)
    np.testing.assert_allclose(np.asarray(logvar), np.asarray(logvar_r), atol=1e-4, rtol=1e-4)

    print("KERNEL_OK")
</pallas_src>

<mosaic_0001>
module attributes {stable_mosaic.version = 11 : i64} {
  func.func @decoder_kernel(%arg0: memref<4x64xf32, #tpu.memory_space<vmem>>, %arg1: memref<4x64xf32, #tpu.memory_space<vmem>>, %arg2: memref<4x16xf32, #tpu.memory_space<vmem>>, %arg3: memref<32x64xf32, #tpu.memory_space<vmem>>, %arg4: memref<32x16xf32, #tpu.memory_space<vmem>>, %arg5: memref<48x64xf32, #tpu.memory_space<vmem>>, %arg6: memref<96x48xf32, #tpu.memory_space<vmem>>, %arg7: memref<3x32x32xf32, #tpu.memory_space<vmem>>, %arg8: memref<384x32xf32, #tpu.memory_space<vmem>>, %arg9: memref<384x64xf32, #tpu.memory_space<vmem>>, %arg10: memref<1x384xf32, #tpu.memory_space<vmem>>, %arg11: memref<8x128xf32, #tpu.memory_space<vmem>>, %arg12: memref<4x384xf32, #tpu.memory_space<vmem>>, %arg13: memref<4x32xf32, #tpu.memory_space<vmem>>) attributes {dimension_semantics = [], scalar_prefetch = 0 : i64, scratch_operands = 0 : i64, tpu.core_type = #tpu.core_type<tc>} {
    %c0 = arith.constant 0 : index
    %c0_0 = arith.constant 0 : index
    %0 = vector.load %arg0[%c0, %c0_0] : memref<4x64xf32, #tpu.memory_space<vmem>>, vector<4x64xf32>
    %c0_1 = arith.constant 0 : index
    %c0_2 = arith.constant 0 : index
    %1 = vector.load %arg1[%c0_1, %c0_2] : memref<4x64xf32, #tpu.memory_space<vmem>>, vector<4x64xf32>
    %c0_3 = arith.constant 0 : index
    %c0_4 = arith.constant 0 : index
    %2 = vector.load %arg2[%c0_3, %c0_4] : memref<4x16xf32, #tpu.memory_space<vmem>>, vector<4x16xf32>
    %c0_5 = arith.constant 0 : index
    %c0_6 = arith.constant 0 : index
    %3 = vector.load %arg9[%c0_5, %c0_6] : memref<384x64xf32, #tpu.memory_space<vmem>>, vector<384x64xf32>
    %cst = arith.constant dense<0.000000e+00> : vector<4x384xf32>
    %4 = tpu.matmul %0, %3, %cst {dimension_numbers = #tpu.dot_dimension_numbers<[1], [1], [0], [0], [0, 0, 1, 0], [], []>} : vector<4x64xf32>, vector<384x64xf32>, vector<4x384xf32> -> vector<4x384xf32>
    %c0_7 = arith.constant 0 : index
    %c0_8 = arith.constant 0 : index
    %5 = vector.load %arg10[%c0_7, %c0_8] : memref<1x384xf32, #tpu.memory_space<vmem>>, vector<1x384xf32>
    %6 = vector.broadcast %5 : vector<1x384xf32> to vector<4x384xf32>
    %7 = arith.addf %4, %6 : vector<4x384xf32>
    %c0_9 = arith.constant 0 : index
    %c0_10 = arith.constant 0 : index
    %8 = vector.load %arg5[%c0_9, %c0_10] : memref<48x64xf32, #tpu.memory_space<vmem>>, vector<48x64xf32>
    %cst_11 = arith.constant dense<0.000000e+00> : vector<4x48xf32>
    %9 = tpu.matmul %0, %8, %cst_11 {dimension_numbers = #tpu.dot_dimension_numbers<[1], [1], [0], [0], [0, 0, 1, 0], [], []>} : vector<4x64xf32>, vector<48x64xf32>, vector<4x48xf32> -> vector<4x48xf32>
    %c4 = arith.constant 4 : index
    %c0_12 = arith.constant 0 : index
    %10 = vector.load %arg11[%c4, %c0_12] : memref<8x128xf32, #tpu.memory_space<vmem>>, vector<1x48xf32>
    %11 = vector.broadcast %10 : vector<1x48xf32> to vector<4x48xf32>
    %12 = arith.addf %9, %11 : vector<4x48xf32>
    %c0_13 = arith.constant 0 : index
    %c0_14 = arith.constant 0 : index
    %13 = vector.load %arg6[%c0_13, %c0_14] : memref<96x48xf32, #tpu.memory_space<vmem>>, vector<96x48xf32>
    %cst_15 = arith.constant dense<0.000000e+00> : vector<4x96xf32>
    %14 = tpu.matmul %12, %13, %cst_15 {dimension_numbers = #tpu.dot_dimension_numbers<[1], [1], [0], [0], [0, 0, 1, 0], [], []>} : vector<4x48xf32>, vector<96x48xf32>, vector<4x96xf32> -> vector<4x96xf32>
    %c5 = arith.constant 5 : index
    %c0_16 = arith.constant 0 : index
    %15 = vector.load %arg11[%c5, %c0_16] : memref<8x128xf32, #tpu.memory_space<vmem>>, vector<1x96xf32>
    %16 = vector.broadcast %15 : vector<1x96xf32> to vector<4x96xf32>
    %17 = arith.addf %14, %16 : vector<4x96xf32>
    %c0_17 = arith.constant 0 : index
    %c0_18 = arith.constant 0 : index
    %18 = vector.load %arg3[%c0_17, %c0_18] : memref<32x64xf32, #tpu.memory_space<vmem>>, vector<32x64xf32>
    %cst_19 = arith.constant dense<0.000000e+00> : vector<4x32xf32>
    %19 = tpu.matmul %1, %18, %cst_19 {dimension_numbers = #tpu.dot_dimension_numbers<[1], [1], [0], [0], [0, 0, 1, 0], [], []>} : vector<4x64xf32>, vector<32x64xf32>, vector<4x32xf32> -> vector<4x32xf32>
    %c0_20 = arith.constant 0 : index
    %c0_21 = arith.constant 0 : index
    %20 = vector.load %arg11[%c0_20, %c0_21] : memref<8x128xf32, #tpu.memory_space<vmem>>, vector<1x32xf32>
    %21 = vector.broadcast %20 : vector<1x32xf32> to vector<4x32xf32>
    %22 = arith.addf %19, %21 : vector<4x32xf32>
    %c0_22 = arith.constant 0 : index
    %c0_23 = arith.constant 0 : index
    %23 = vector.load %arg13[%c0_22, %c0_23] : memref<4x32xf32, #tpu.memory_space<vmem>>, vector<4x32xf32>
    tpu.vector_store %arg13[%c0_22, %c0_23], %22 {strides = array<i32>} : memref<4x32xf32, #tpu.memory_space<vmem>>, vector<4x32xf32>,
    %24 = vector.extract_strided_slice %22 {offsets = [0, 0], sizes = [4, 16], strides = [1, 1]} : vector<4x32xf32> to vector<4x16xf32>
    %25 = vector.extract_strided_slice %22 {offsets = [0, 16], sizes = [4, 16], strides = [1, 1]} : vector<4x32xf32> to vector<4x16xf32>
    %cst_24 = arith.constant 5.000000e-01 : f32
    %26 = vector.broadcast %cst_24 : f32 to vector<4x16xf32>
    %27 = arith.mulf %26, %25 : vector<4x16xf32>
    %28 = math.exp %27 : vector<4x16xf32>
    %29 = arith.mulf %2, %28 : vector<4x16xf32>
    %30 = arith.addf %29, %24 : vector<4x16xf32>
    %31 = arith.mulf %30, %30 : vector<4x16xf32>
    %cst_25 = arith.constant dense<0.000000e+00> : vector<4xf32>
    %32 = vector.multi_reduction <add>, %31, %cst_25 [1] : vector<4x16xf32> to vector<4xf32>
    %33 = vector.shape_cast %32 : vector<4xf32> to vector<4x1xf32>
    %cst_26 = arith.constant 1.600000e+01 : f32
    %34 = vector.broadcast %cst_26 : f32 to vector<4x1xf32>
    %35 = arith.divf %33, %34 : vector<4x1xf32>
    %cst_27 = arith.constant 9.99999993E-9 : f32
    %36 = vector.broadcast %cst_27 : f32 to vector<4x1xf32>
    %37 = arith.addf %35, %36 : vector<4x1xf32>
    %38 = math.rsqrt %37 : vector<4x1xf32>
    %39 = vector.broadcast %38 : vector<4x1xf32> to vector<4x16xf32>
    %40 = arith.mulf %30, %39 : vector<4x16xf32>
    %c0_28 = arith.constant 0 : index
    %c0_29 = arith.constant 0 : index
    %41 = vector.load %arg4[%c0_28, %c0_29] : memref<32x16xf32, #tpu.memory_space<vmem>>, vector<32x16xf32>
    %cst_30 = arith.constant dense<0.000000e+00> : vector<4x32xf32>
    %42 = tpu.matmul %40, %41, %cst_30 {dimension_numbers = #tpu.dot_dimension_numbers<[1], [1], [0], [0], [0, 0, 1, 0], [], []>} : vector<4x16xf32>, vector<32x16xf32>, vector<4x32xf32> -> vector<4x32xf32>
    %c1 = arith.constant 1 : index
    %c0_31 = arith.constant 0 : index
    %43 = vector.load %arg11[%c1, %c0_31] : memref<8x128xf32, #tpu.memory_space<vmem>>, vector<1x32xf32>
    %44 = vector.broadcast %43 : vector<1x32xf32> to vector<4x32xf32>
    %45 = arith.addf %42, %44 : vector<4x32xf32>
    %cst_32 = arith.constant 0.000000e+00 : f32
    %46 = vector.broadcast %cst_32 : f32 to vector<4x32xf32>
    %47 = arith.cmpf ogt, %45, %46 : vector<4x32xf32>
    %cst_33 = arith.constant 2.000000e-01 : f32
    %48 = vector.broadcast %cst_33 : f32 to vector<4x32xf32>
    %49 = arith.mulf %48, %45 : vector<4x32xf32>
    %50 = arith.select %47, %45, %49 : vector<4x32xi1>, vector<4x32xf32>
    %c2 = arith.constant 2 : index
    %c0_34 = arith.constant 0 : index
    %51 = vector.load %arg11[%c2, %c0_34] : memref<8x128xf32, #tpu.memory_space<vmem>>, vector<1x32xf32>
    %c3 = arith.constant 3 : index
    %c0_35 = arith.constant 0 : index
    %52 = vector.load %arg11[%c3, %c0_35] : memref<8x128xf32, #tpu.memory_space<vmem>>, vector<1x32xf32>
    %cst_36 = arith.constant dense<0.000000e+00> : vector<32xf32>
    %53 = vector.multi_reduction <add>, %50, %cst_36 [0] : vector<4x32xf32> to vector<32xf32>
    %54 = vector.shape_cast %53 : vector<32xf32> to vector<1x32xf32>
    %cst_37 = arith.constant 4.000000e+00 : f32
    %55 = vector.broadcast %cst_37 : f32 to vector<1x32xf32>
    %56 = arith.divf %54, %55 : vector<1x32xf32>
    %57 = arith.mulf %50, %50 : vector<4x32xf32>
    %cst_38 = arith.constant dense<0.000000e+00> : vector<32xf32>
    %58 = vector.multi_reduction <add>, %57, %cst_38 [0] : vector<4x32xf32> to vector<32xf32>
    %59 = vector.shape_cast %58 : vector<32xf32> to vector<1x32xf32>
    %cst_39 = arith.constant 4.000000e+00 : f32
    %60 = vector.broadcast %cst_39 : f32 to vector<1x32xf32>
    %61 = arith.divf %59, %60 : vector<1x32xf32>
    %62 = arith.mulf %56, %56 : vector<1x32xf32>
    %63 = arith.subf %61, %62 : vector<1x32xf32>
    %cst_40 = arith.constant 9.99999974E-6 : f32
    %64 = vector.broadcast %cst_40 : f32 to vector<1x32xf32>
    %65 = arith.addf %63, %64 : vector<1x32xf32>
    %66 = math.rsqrt %65 : vector<1x32xf32>
    %67 = arith.mulf %51, %66 : vector<1x32xf32>
    %68 = vector.broadcast %67 : vector<1x32xf32> to vector<4x32xf32>
    %69 = arith.mulf %50, %68 : vector<4x32xf32>
    %70 = arith.mulf %56, %67 : vector<1x32xf32>
    %71 = arith.subf %52, %70 : vector<1x32xf32>
    %72 = vector.broadcast %71 : vector<1x32xf32> to vector<4x32xf32>
    %73 = arith.addf %69, %72 : vector<4x32xf32>
    %c0_41 = arith.constant 0 : index
    %c0_42 = arith.constant 0 : index
    %c0_43 = arith.constant 0 : index
    %74 = vector.load %arg7[%c0_41, %c0_42, %c0_43] : memref<3x32x32xf32, #tpu.memory_space<vmem>>, vector<1x32x32xf32>
    %75 = vector.shape_cast %74 : vector<1x32x32xf32> to vector<32x32xf32>
    %cst_44 = arith.constant dense<0.000000e+00> : vector<4x32xf32>
    %76 = tpu.matmul %73, %75, %cst_44 {dimension_numbers = #tpu.dot_dimension_numbers<[1], [1], [0], [0], [0, 0, 1, 0], [], []>} : vector<4x32xf32>, vector<32x32xf32>, vector<4x32xf32> -> vector<4x32xf32>
    %77 = vector.extract_strided_slice %17 {offsets = [0, 0], sizes = [4, 32], strides = [1, 1]} : vector<4x96xf32> to vector<4x32xf32>
    %78 = arith.addf %76, %77 : vector<4x32xf32>
    %cst_45 = arith.constant 0.000000e+00 : f32
    %79 = vector.broadcast %cst_45 : f32 to vector<4x32xf32>
    %80 = arith.cmpf ogt, %78, %79 : vector<4x32xf32>
    %cst_46 = arith.constant 2.000000e-01 : f32
    %81 = vector.broadcast %cst_46 : f32 to vector<4x32xf32>
    %82 = arith.mulf %81, %78 : vector<4x32xf32>
    %83 = arith.select %80, %78, %82 : vector<4x32xi1>, vector<4x32xf32>
    %c6 = arith.constant 6 : index
    %c0_47 = arith.constant 0 : index
    %84 = vector.load %arg11[%c6, %c0_47] : memref<8x128xf32, #tpu.memory_space<vmem>>, vector<1x32xf32>
    %c7 = arith.constant 7 : index
    %c0_48 = arith.constant 0 : index
    %85 = vector.load %arg11[%c7, %c0_48] : memref<8x128xf32, #tpu.memory_space<vmem>>, vector<1x32xf32>
    %cst_49 = arith.constant dense<0.000000e+00> : vector<32xf32>
    %86 = vector.multi_reduction <add>, %83, %cst_49 [0] : vector<4x32xf32> to vector<32xf32>
    %87 = vector.shape_cast %86 : vector<32xf32> to vector<1x32xf32>
    %cst_50 = arith.constant 4.000000e+00 : f32
    %88 = vector.broadcast %cst_50 : f32 to vector<1x32xf32>
    %89 = arith.divf %87, %88 : vector<1x32xf32>
    %90 = arith.mulf %83, %83 : vector<4x32xf32>
    %cst_51 = arith.constant dense<0.000000e+00> : vector<32xf32>
    %91 = vector.multi_reduction <add>, %90, %cst_51 [0] : vector<4x32xf32> to vector<32xf32>
    %92 = vector.shape_cast %91 : vector<32xf32> to vector<1x32xf32>
    %cst_52 = arith.constant 4.000000e+00 : f32
    %93 = vector.broadcast %cst_52 : f32 to vector<1x32xf32>
    %94 = arith.divf %92, %93 : vector<1x32xf32>
    %95 = arith.mulf %89, %89 : vector<1x32xf32>
    %96 = arith.subf %94, %95 : vector<1x32xf32>
    %cst_53 = arith.constant 9.99999974E-6 : f32
    %97 = vector.broadcast %cst_53 : f32 to vector<1x32xf32>
    %98 = arith.addf %96, %97 : vector<1x32xf32>
    %99 = math.rsqrt %98 : vector<1x32xf32>
    %100 = arith.mulf %84, %99 : vector<1x32xf32>
    %101 = vector.broadcast %100 : vector<1x32xf32> to vector<4x32xf32>
    %102 = arith.mulf %83, %101 : vector<4x32xf32>
    %103 = arith.mulf %89, %100 : vector<1x32xf32>
    %104 = arith.subf %85, %103 : vector<1x32xf32>
    %105 = vector.broadcast %104 : vector<1x32xf32> to vector<4x32xf32>
    %106 = arith.addf %102, %105 : vector<4x32xf32>
    %c1_54 = arith.constant 1 : index
    %c0_55 = arith.constant 0 : index
    %c0_56 = arith.constant 0 : index
    %107 = vector.load %arg7[%c1_54, %c0_55, %c0_56] : memref<3x32x32xf32, #tpu.memory_space<vmem>>, vector<1x32x32xf32>
    %108 = vector.shape_cast %107 : vector<1x32x32xf32> to vector<32x32xf32>
    %cst_57 = arith.constant dense<0.000000e+00> : vector<4x32xf32>
    %109 = tpu.matmul %106, %108, %cst_57 {dimension_numbers = #tpu.dot_dimension_numbers<[1], [1], [0], [0], [0, 0, 1, 0], [], []>} : vector<4x32xf32>, vector<32x32xf32>, vector<4x32xf32> -> vector<4x32xf32>
    %110 = vector.extract_strided_slice %17 {offsets = [0, 32], sizes = [4, 32], strides = [1, 1]} : vector<4x96xf32> to vector<4x32xf32>
    %111 = arith.addf %109, %110 : vector<4x32xf32>
    %cst_58 = arith.constant 0.000000e+00 : f32
    %112 = vector.broadcast %cst_58 : f32 to vector<4x32xf32>
    %113 = arith.cmpf ogt, %111, %112 : vector<4x32xf32>
    %cst_59 = arith.constant 2.000000e-01 : f32
    %114 = vector.broadcast %cst_59 : f32 to vector<4x32xf32>
    %115 = arith.mulf %114, %111 : vector<4x32xf32>
    %116 = arith.select %113, %111, %115 : vector<4x32xi1>, vector<4x32xf32>
    %c6_60 = arith.constant 6 : index
    %c32 = arith.constant 32 : index
    %117 = vector.load %arg11[%c6_60, %c32] : memref<8x128xf32, #tpu.memory_space<vmem>>, vector<1x32xf32>
    %c7_61 = arith.constant 7 : index
    %c32_62 = arith.constant 32 : index
    %118 = vector.load %arg11[%c7_61, %c32_62] : memref<8x128xf32, #tpu.memory_space<vmem>>, vector<1x32xf32>
    %cst_63 = arith.constant dense<0.000000e+00> : vector<32xf32>
    %119 = vector.multi_reduction <add>, %116, %cst_63 [0] : vector<4x32xf32> to vector<32xf32>
    %120 = vector.shape_cast %119 : vector<32xf32> to vector<1x32xf32>
    %cst_64 = arith.constant 4.000000e+00 : f32
    %121 = vector.broadcast %cst_64 : f32 to vector<1x32xf32>
    %122 = arith.divf %120, %121 : vector<1x32xf32>
    %123 = arith.mulf %116, %116 : vector<4x32xf32>
    %cst_65 = arith.constant dense<0.000000e+00> : vector<32xf32>
    %124 = vector.multi_reduction <add>, %123, %cst_65 [0] : vector<4x32xf32> to vector<32xf32>
    %125 = vector.shape_cast %124 : vector<32xf32> to vector<1x32xf32>
    %cst_66 = arith.constant 4.000000e+00 : f32
    %126 = vector.broadcast %cst_66 : f32 to vector<1x32xf32>
    %127 = arith.divf %125, %126 : vector<1x32xf32>
    %128 = arith.mulf %122, %122 : vector<1x32xf32>
    %129 = arith.subf %127, %128 : vector<1x32xf32>
    %cst_67 = arith.constant 9.99999974E-6 : f32
    %130 = vector.broadcast %cst_67 : f32 to vector<1x32xf32>
    %131 = arith.addf %129, %130 : vector<1x32xf32>
    %132 = math.rsqrt %131 : vector<1x32xf32>
    %133 = arith.mulf %117, %132 : vector<1x32xf32>
    %134 = vector.broadcast %133 : vector<1x32xf32> to vector<4x32xf32>
    %135 = arith.mulf %116, %134 : vector<4x32xf32>
    %136 = arith.mulf %122, %133 : vector<1x32xf32>
    %137 = arith.subf %118, %136 : vector<1x32xf32>
    %138 = vector.broadcast %137 : vector<1x32xf32> to vector<4x32xf32>
    %139 = arith.addf %135, %138 : vector<4x32xf32>
    %c2_68 = arith.constant 2 : index
    %c0_69 = arith.constant 0 : index
    %c0_70 = arith.constant 0 : index
    %140 = vector.load %arg7[%c2_68, %c0_69, %c0_70] : memref<3x32x32xf32, #tpu.memory_space<vmem>>, vector<1x32x32xf32>
    %141 = vector.shape_cast %140 : vector<1x32x32xf32> to vector<32x32xf32>
    %cst_71 = arith.constant dense<0.000000e+00> : vector<4x32xf32>
    %142 = tpu.matmul %139, %141, %cst_71 {dimension_numbers = #tpu.dot_dimension_numbers<[1], [1], [0], [0], [0, 0, 1, 0], [], []>} : vector<4x32xf32>, vector<32x32xf32>, vector<4x32xf32> -> vector<4x32xf32>
    %143 = vector.extract_strided_slice %17 {offsets = [0, 64], sizes = [4, 32], strides = [1, 1]} : vector<4x96xf32> to vector<4x32xf32>
    %144 = arith.addf %142, %143 : vector<4x32xf32>
    %cst_72 = arith.constant 0.000000e+00 : f32
    %145 = vector.broadcast %cst_72 : f32 to vector<4x32xf32>
    %146 = arith.cmpf ogt, %144, %145 : vector<4x32xf32>
    %cst_73 = arith.constant 2.000000e-01 : f32
    %147 = vector.broadcast %cst_73 : f32 to vector<4x32xf32>
    %148 = arith.mulf %147, %144 : vector<4x32xf32>
    %149 = arith.select %146, %144, %148 : vector<4x32xi1>, vector<4x32xf32>
    %c6_74 = arith.constant 6 : index
    %c64 = arith.constant 64 : index
    %150 = vector.load %arg11[%c6_74, %c64] : memref<8x128xf32, #tpu.memory_space<vmem>>, vector<1x32xf32>
    %c7_75 = arith.constant 7 : index
    %c64_76 = arith.constant 64 : index
    %151 = vector.load %arg11[%c7_75, %c64_76] : memref<8x128xf32, #tpu.memory_space<vmem>>, vector<1x32xf32>
    %cst_77 = arith.constant dense<0.000000e+00> : vector<32xf32>
    %152 = vector.multi_reduction <add>, %149, %cst_77 [0] : vector<4x32xf32> to vector<32xf32>
    %153 = vector.shape_cast %152 : vector<32xf32> to vector<1x32xf32>
    %cst_78 = arith.constant 4.000000e+00 : f32
    %154 = vector.broadcast %cst_78 : f32 to vector<1x32xf32>
    %155 = arith.divf %153, %154 : vector<1x32xf32>
    %156 = arith.mulf %149, %149 : vector<4x32xf32>
    %cst_79 = arith.constant dense<0.000000e+00> : vector<32xf32>
    %157 = vector.multi_reduction <add>, %156, %cst_79 [0] : vector<4x32xf32> to vector<32xf32>
    %158 = vector.shape_cast %157 : vector<32xf32> to vector<1x32xf32>
    %cst_80 = arith.constant 4.000000e+00 : f32
    %159 = vector.broadcast %cst_80 : f32 to vector<1x32xf32>
    %160 = arith.divf %158, %159 : vector<1x32xf32>
    %161 = arith.mulf %155, %155 : vector<1x32xf32>
    %162 = arith.subf %160, %161 : vector<1x32xf32>
    %cst_81 = arith.constant 9.99999974E-6 : f32
    %163 = vector.broadcast %cst_81 : f32 to vector<1x32xf32>
    %164 = arith.addf %162, %163 : vector<1x32xf32>
    %165 = math.rsqrt %164 : vector<1x32xf32>
    %166 = arith.mulf %150, %165 : vector<1x32xf32>
    %167 = vector.broadcast %166 : vector<1x32xf32> to vector<4x32xf32>
    %168 = arith.mulf %149, %167 : vector<4x32xf32>
    %169 = arith.mulf %155, %166 : vector<1x32xf32>
    %170 = arith.subf %151, %169 : vector<1x32xf32>
    %171 = vector.broadcast %170 : vector<1x32xf32> to vector<4x32xf32>
    %172 = arith.addf %168, %171 : vector<4x32xf32>
    %c0_82 = arith.constant 0 : index
    %c0_83 = arith.constant 0 : index
    %173 = vector.load %arg8[%c0_82, %c0_83] : memref<384x32xf32, #tpu.memory_space<vmem>>, vector<384x32xf32>
    %cst_84 = arith.constant dense<0.000000e+00> : vector<4x384xf32>
    %174 = tpu.matmul %172, %173, %cst_84 {dimension_numbers = #tpu.dot_dimension_numbers<[1], [1], [0], [0], [0, 0, 1, 0], [], []>} : vector<4x32xf32>, vector<384x32xf32>, vector<4x384xf32> -> vector<4x384xf32>
    %175 = arith.addf %7, %174 : vector<4x384xf32>
    %c0_85 = arith.constant 0 : index
    %c0_86 = arith.constant 0 : index
    %176 = vector.load %arg12[%c0_85, %c0_86] : memref<4x384xf32, #tpu.memory_space<vmem>>, vector<4x384xf32>
    tpu.vector_store %arg12[%c0_85, %c0_86], %175 {strides = array<i32>} : memref<4x384xf32, #tpu.memory_space<vmem>>, vector<4x384xf32>,
    return
  }
}

</mosaic_0001>

<bundles_post_ra>
// kernel: tpu_custom_call.1
= control target key start
LH: loop header
LB: loop body
LE: loop exit
PB: predicated region body
PF: predicated region fallthrough
CT: control target
= control target key end

     0   :  { %19 = vsyncpa [#allocation3], 0  ;;  %vm113_vm0 = vcmask 523264   ;;  %v2216_v3 = vmov 0.0   ;;  %vm2217_vm1 = vmmov 0   ;;  %s3044_s0 = inlined_call_operand.vmem [shape: f32[4,64], index: 0, kind: input, shape index: {}]   ;;  %s3045_s1 = inlined_call_operand.vmem [shape: f32[4,64], index: 1, kind: input, shape index: {}]   ;;  %s3046_s2 = inlined_call_operand.vmem [shape: f32[4,16], index: 2, kind: input, shape index: {}]   ;;  %s3047_s3 = inlined_call_operand.vmem [shape: f32[32,64], index: 3, kind: input, shape index: {}]   ;;  %s3048_s4 = inlined_call_operand.vmem [shape: f32[32,16], index: 4, kind: input, shape index: {}]   ;;  %s3049_s5 = inlined_call_operand.vmem [shape: f32[48,64], index: 5, kind: input, shape index: {}]   ;;  %s3050_s6 = inlined_call_operand.vmem [shape: f32[96,48], index: 6, kind: input, shape index: {}]   ;;  %s3051_s7 = inlined_call_operand.vmem [shape: f32[3,32,32], index: 7, kind: input, shape index: {}]   ;;  %s3052_s8 = inlined_call_operand.vmem [shape: f32[384,32], index: 8, kind: input, shape index: {}]   ;;  %s3053_s9 = inlined_call_operand.vmem [shape: f32[384,64], index: 9, kind: input, shape index: {}]   ;;  %s3054_s10 = inlined_call_operand.vmem [shape: f32[1,384], index: 10, kind: input, shape index: {}]   ;;  %s3055_s11 = inlined_call_operand.vmem [shape: f32[8,128], index: 11, kind: input, shape index: {}]   ;;  %s3056_s12 = inlined_call_operand.hbm [shape: f32[4,384], index: 12, kind: output, shape index: {0}]   ;;  %s3057_s13 = inlined_call_operand.hbm [shape: f32[4,32], index: 13, kind: output, shape index: {1}]  }
   0x1   :  { %v79_v0 = vld [vmem:[%s3053_s9 + $0xf8] sm:$0xff]  ;;  %v78_v2 = vld [vmem:[%s3053_s9 + $0xf0] sm:$0xff]  ;;  %1985 = vmatprep.subr.mxu1 %v2216_v3  ;;  %2017 = vmatprep.mubr.msk.f32.mxu1 %vm2217_vm1, %v2216_v3  ;;  %v77_v5 = vld [vmem:[%s3053_s9 + $0xe8] sm:$0xff] }
   0x2   :  { %v63_v1 = vld [vmem:[%s3053_s9 + $0x78] sm:$0xff]  ;;  %1838 = vmatprep.subr.msk.mxu0 %vm113_vm0, %v79_v0  ;;  %v62_v4 = vld [vmem:[%s3053_s9 + $0x70] sm:$0xff]  ;;  %v61_v6 = vld [vmem:[%s3053_s9 + $0x68] sm:$0xff] }
   0x3   :  { %1839 = vmatpush3.xpose.msk.msra.mxu0 %vm113_vm0, %v63_v1  ;;  %v76_v7 = vld [vmem:[%s3053_s9 + $0xe0] sm:$0xff]  ;;  %v75_v10 = vld [vmem:[%s3053_s9 + $0xd8] sm:$0xff]  ;;  %v74_v13 = vld [vmem:[%s3053_s9 + $0xd0] sm:$0xff] }
   0x4   :  { %1840 = vmatprep.subr.msk.mxu0 %vm113_vm0, %v78_v2  ;;  %v2327_v8 = vld [vmem:[%s3044_s0] sm:$0xf]  ;;  %v95_v11 = vld [vmem:[%s3053_s9 + $0x178] sm:$0xff]  ;;  %v94_v14 = vld [vmem:[%s3053_s9 + $0x170] sm:$0xff] }
   0x5   :  { %v60_v9 = vld [vmem:[%s3053_s9 + $0x60] sm:$0xff]  ;;  %1870 = vmatprep.mubr.msk.f32.mxu0 %vm113_vm0, %v2327_v8  ;;  %v59_v12 = vld [vmem:[%s3053_s9 + $0x58] sm:$0xff]  ;;  %1986 = vmatpush3.xpose.msk.msra.mxu1 %vm113_vm0, %v95_v11  ;;  %v58_v15 = vld [vmem:[%s3053_s9 + $0x50] sm:$0xff] }
   0x6   :  { %1987 = vmatprep.subr.mxu1 %v2216_v3  ;;  %v73_v16 = vld [vmem:[%s3053_s9 + $0xc8] sm:$0xff] }
   0x7   :  { %1841 = vmatpush3.xpose.msk.msra.mxu0 %vm113_vm0, %v62_v4  ;;  %v93_v17 = vld [vmem:[%s3053_s9 + $0x168] sm:$0xff] }
   0x8   :  { %1842 = vmatprep.subr.msk.mxu0 %vm113_vm0, %v77_v5 }
   0x9   :  { %1988 = vmatpush3.xpose.msk.msra.mxu1 %vm113_vm0, %v94_v14 }
   0xa   :  { %1989 = vmatprep.subr.mxu1 %v2216_v3 }
   0xb   :  { %1843 = vmatpush3.xpose.msk.msra.mxu0 %vm113_vm0, %v61_v6 }
   0xc   :  { %1844 = vmatprep.subr.msk.mxu0 %vm113_vm0, %v76_v7 }
   0xf   :  { %1845 = vmatpush3.xpose.msk.msra.mxu0 %vm113_vm0, %v60_v9 }
  0x10   :  { %1846 = vmatprep.subr.msk.mxu0 %vm113_vm0, %v75_v10 }
  0x13   :  { %1847 = vmatpush3.xpose.msk.msra.mxu0 %vm113_vm0, %v59_v12 }
  0x14   :  { %1848 = vmatprep.subr.msk.mxu0 %vm113_vm0, %v74_v13 }
  0x17   :  { %1849 = vmatpush3.xpose.msk.msra.mxu0 %vm113_vm0, %v58_v15 }
  0x18   :  { %20 = vsyncpa [#allocation5], 0  ;;  %1850 = vmatprep.subr.msk.mxu0 %vm113_vm0, %v73_v16  ;;  %v57_v18 = vld [vmem:[%s3053_s9 + $0x48] sm:$0xff]  ;;  %1990 = vmatpush3.xpose.msk.msra.mxu1 %vm113_vm0, %v93_v17  ;;  %v72_v19 = vld [vmem:[%s3053_s9 + $0xc0] sm:$0xff]  ;;  %vm518_vm2 = vcmask 392192   ;;  %vm722_vm3 = vcmask 257024  }
  0x19   :  { %1991 = vmatprep.subr.mxu1 %v2216_v3  ;;  %v92_v20 = vld [vmem:[%s3053_s9 + $0x160] sm:$0xff]  ;;  %v71_v22 = vld [vmem:[%s3053_s9 + $0xb8] sm:$0xff]  ;;  %v70_v25 = vld [vmem:[%s3053_s9 + $0xb0] sm:$0xff]  ;;  %s2218_s23 = smov 112   ;;  %vm734_vm4 = vcmask 125952   ;;  %vm752_vm5 = vcmask 130048  }
  0x1a   :  { %v56_v21 = vld [vmem:[%s3053_s9 + $0x40] sm:$0xff]  ;;  %v91_v23 = vld [vmem:[%s3053_s9 + $0x158] sm:$0xff]  ;;  %v90_v26 = vld [vmem:[%s3053_s9 + $0x150] sm:$0xff]  ;;  %s2219_s14 = smov 96   ;;  %vm882_vm6 = vcmask 261120   ;;  %s2221_s22 = smov 64  }
  0x1b   :  { %1851 = vmatpush3.xpose.msk.msra.mxu0 %vm113_vm0, %v57_v18  ;;  %v55_v24 = vld [vmem:[%s3053_s9 + $0x38] sm:$0xff]  ;;  %v54_v27 = vld [vmem:[%s3053_s9 + $0x30] sm:$0xff]  ;;  %v69_v28 = vld [vmem:[%s3053_s9 + $0xa8] sm:$0xff] }
  0x1c   :  { %1852 = vmatprep.subr.msk.mxu0 %vm113_vm0, %v72_v19  ;;  %1992 = vmatpush3.xpose.msk.msra.mxu1 %vm113_vm0, %v92_v20  ;;  %v89_v29 = vld [vmem:[%s3053_s9 + $0x148] sm:$0xff]  ;;  %v68_v31 = vld [vmem:[%s3053_s9 + $0xa0] sm:$0xff]  ;;  %v67_v34 = vld [vmem:[%s3053_s9 + $0x98] sm:$0xff] }
  0x1d   :  { %1993 = vmatprep.subr.mxu1 %v2216_v3  ;;  %v53_v30 = vld [vmem:[%s3053_s9 + $0x28] sm:$0xff]  ;;  %v88_v32 = vld [vmem:[%s3053_s9 + $0x140] sm:$0xff]  ;;  %v87_v35 = vld [vmem:[%s3053_s9 + $0x138] sm:$0xff] }
  0x1e   :  { %v52_v33 = vld [vmem:[%s3053_s9 + $0x20] sm:$0xff]  ;;  %v51_v36 = vld [vmem:[%s3053_s9 + $0x18] sm:$0xff]  ;;  %v66_v37 = vld [vmem:[%s3053_s9 + $0x90] sm:$0xff] }
  0x1f   :  { %1853 = vmatpush3.xpose.msk.msra.mxu0 %vm113_vm0, %v56_v21  ;;  %v86_v38 = vld [vmem:[%s3053_s9 + $0x130] sm:$0xff]  ;;  %v65_v40 = vld [vmem:[%s3053_s9 + $0x88] sm:$0xff]  ;;  %v64_v43 = vld [vmem:[%s3053_s9 + $0x80] sm:$0xff] }
  0x20   :  { %1854 = vmatprep.subr.msk.mxu0 %vm113_vm0, %v71_v22  ;;  %1994 = vmatpush3.xpose.msk.msra.mxu1 %vm113_vm0, %v91_v23  ;;  %v50_v39 = vld [vmem:[%s3053_s9 + $0x10] sm:$0xff]  ;;  %v85_v41 = vld [vmem:[%s3053_s9 + $0x128] sm:$0xff]  ;;  %v84_v44 = vld [vmem:[%s3053_s9 + $0x120] sm:$0xff] }
  0x21   :  { %1995 = vmatprep.subr.mxu1 %v2216_v3  ;;  %v49_v42 = vld [vmem:[%s3053_s9 + $0x8] sm:$0xff]  ;;  %v48_v45 = vld [vmem:[%s3053_s9] sm:$0xff]  ;;  %v83_v46 = vld [vmem:[%s3053_s9 + $0x118] sm:$0xff] }
  0x22   :  { %v407_v47 = vld [vmem:[%s3049_s5 + $0x28] sm:$0xff]  ;;  %v82_v48 = vld [vmem:[%s3053_s9 + $0x110] sm:$0xff]  ;;  %v406_v49 = vld [vmem:[%s3049_s5 + $0x20] sm:$0xff] }
  0x23   :  { %1855 = vmatpush3.xpose.msk.msra.mxu0 %vm113_vm0, %v55_v24  ;;  %v81_v50 = vld [vmem:[%s3053_s9 + $0x108] sm:$0xff]  ;;  %v405_v51 = vld [vmem:[%s3049_s5 + $0x18] sm:$0xff]  ;;  %v80_v52 = vld [vmem:[%s3053_s9 + $0x100] sm:$0xff] }
  0x24   :  { %1856 = vmatprep.subr.msk.mxu0 %vm113_vm0, %v70_v25  ;;  %1996 = vmatpush3.xpose.msk.msra.mxu1 %vm113_vm0, %v90_v26  ;;  %v404_v53 = vld [vmem:[%s3049_s5 + $0x10] sm:$0xff]  ;;  %v512_v54 = vld [vmem:[%s3050_s6 + $0x58] sm:$0xff]  ;;  %v403_v55 = vld [vmem:[%s3049_s5 + $0x8] sm:$0xff] }
  0x25   :  { %1997 = vmatprep.subr.mxu1 %v2216_v3  ;;  %v511_v56 = vld [vmem:[%s3050_s6 + $0x50] sm:$0xff]  ;;  %v402_v57 = vld [vmem:[%s3049_s5] sm:$0xff]  ;;  %v510_v58 = vld [vmem:[%s3050_s6 + $0x48] sm:$0xff] }
  0x26   :  { %v631_v59 = vld [vmem:[%s3047_s3 + $0x18] sm:$0xff]  ;;  %v509_v60 = vld [vmem:[%s3050_s6 + $0x40] sm:$0xff]  ;;  %v630_v61 = vld [vmem:[%s3047_s3 + $0x10] sm:$0xff] }
  0x27   :  { %1857 = vmatpush3.xpose.msk.msra.mxu0 %vm113_vm0, %v54_v27  ;;  %v508_v62 = vld [vmem:[%s3050_s6 + $0x38] sm:$0xff]  ;;  %v629_v63 = vld [vmem:[%s3047_s3 + $0x8] sm:$0xff]  ;;  %v628_v0 = vld [vmem:[%s3047_s3] sm:$0xff] }
  0x28   :  { %1858 = vmatprep.subr.msk.mxu0 %vm113_vm0, %v69_v28  ;;  %1998 = vmatpush3.xpose.msk.msra.mxu1 %vm113_vm0, %v89_v29  ;;  %v46_v1 = vld [vmem:[%s3045_s1] sm:$0xf]  ;;  %v507_v2 = vld [vmem:[%s3050_s6 + $0x30] sm:$0xff]  ;;  %v506_v4 = vld [vmem:[%s3050_s6 + $0x28] sm:$0xff] }
  0x29   :  { %1999 = vmatprep.subr.mxu1 %v2216_v3  ;;  %v505_v5 = vld [vmem:[%s3050_s6 + $0x20] sm:$0xff]  ;;  %v504_v6 = vld [vmem:[%s3050_s6 + $0x18] sm:$0xff]  ;;  %v503_v7 = vld [vmem:[%s3050_s6 + $0x10] sm:$0xff] }
  0x2a   :  { %v501_v9 = vld [vmem:[%s3050_s6] sm:$0xff] }
  0x2b   :  { %1859 = vmatpush3.xpose.msk.msra.mxu0 %vm113_vm0, %v53_v30  ;;  %v1731_v12 = vld [vmem:[%s3055_s11 + $0x4] ss:$0 sm:$0xff]  ;;  %v1753_v16 = vld [vmem:[%s3055_s11] ss:$0 sm:$0xff] }
  0x2c   :  { %1860 = vmatprep.subr.msk.mxu0 %vm113_vm0, %v68_v31  ;;  %2000 = vmatpush3.xpose.msk.msra.mxu1 %vm113_vm0, %v88_v32  ;;  %v47_v25 = vld [vmem:[%s3046_s2] sm:$0xf]  ;;  %v746_v31 = vld [vmem:[%s3048_s4 + $0x18] sm:$0xff]  ;;  %v745_v32 = vld [vmem:[%s3048_s4 + $0x10] sm:$0xff] }
  0x2d   :  { %2001 = vmatprep.subr.mxu1 %v2216_v3 }
  0x2f   :  { %1861 = vmatpush3.xpose.msk.msra.mxu0 %vm113_vm0, %v52_v33  ;;  %v744_v33 = vld [vmem:[%s3048_s4 + $0x8] sm:$0xff] }
  0x30   :  { %1862 = vmatprep.subr.msk.mxu0 %vm113_vm0, %v67_v34  ;;  %2002 = vmatpush3.xpose.msk.msra.mxu1 %vm113_vm0, %v87_v35  ;;  %v743_v34 = vld [vmem:[%s3048_s4] sm:$0xff] }
  0x31   :  { %2003 = vmatprep.subr.mxu1 %v2216_v3  ;;  %v1739_v35 = vld [vmem:[%s3055_s11 + $0x5] ss:$0 sm:$0xff] }
  0x33   :  { %1863 = vmatpush3.xpose.msk.msra.mxu0 %vm113_vm0, %v51_v36 }
  0x34   :  { %1864 = vmatprep.subr.msk.mxu0 %vm113_vm0, %v66_v37  ;;  %2004 = vmatpush3.xpose.msk.msra.mxu1 %vm113_vm0, %v86_v38 }
  0x35   :  { %2005 = vmatprep.subr.mxu1 %v2216_v3 }
  0x37   :  { %1865 = vmatpush3.xpose.msk.msra.mxu0 %vm113_vm0, %v50_v39 }
  0x38   :  { %1866 = vmatprep.subr.msk.mxu0 %vm113_vm0, %v65_v40  ;;  %2006 = vmatpush3.xpose.msk.msra.mxu1 %vm113_vm0, %v85_v41 }
  0x39   :  { %2007 = vmatprep.subr.mxu1 %v2216_v3 }
  0x3b   :  { %1867 = vmatpush3.xpose.msk.msra.mxu0 %vm113_vm0, %v49_v42 }
  0x3c   :  { %1868 = vmatprep.subr.msk.mxu0 %vm113_vm0, %v64_v43  ;;  %2008 = vmatpush3.xpose.msk.msra.mxu1 %vm113_vm0, %v84_v44  ;;  %v881_v44 = vld [vmem:[%s3051_s7 + $0x18] sm:$0xff] }
  0x3d   :  { %2009 = vmatprep.subr.mxu1 %v2216_v3 }
  0x3f   :  { %1869 = vmatpush3.xpose.msk.msra.mxu0 %vm113_vm0, %v48_v45  ;;  %v880_v45 = vld [vmem:[%s3051_s7 + $0x10] sm:$0xff] }
  0x40   :  { %2020 = vmatprep.subr.mxu0 %v2216_v3  ;;  %2010 = vmatpush3.xpose.msk.msra.mxu1 %vm113_vm0, %v83_v46  ;;  %v879_v46 = vld [vmem:[%s3051_s7 + $0x8] sm:$0xff] }
  0x41   :  { %2011 = vmatprep.subr.mxu1 %v2216_v3 }
  0x42   :  { %1871 = vmatmul.mubr.msk.f32.vlgmr.msra.gmra.mxu0 %vm113_vm0, %v2327_v8 }
  0x43   :  { %2021 = vmatpush3.xpose.msk.msra.mxu0 %vm113_vm0, %v407_v47  ;;  %2032 = vmatprep.mubr.msk.f32.mxu0 %vm2217_vm1, %v2216_v3  ;;  %v878_v47 = vld [vmem:[%s3051_s7] sm:$0xff] }
  0x44   :  { %2022 = vmatprep.subr.mxu0 %v2216_v3  ;;  %2012 = vmatpush3.xpose.msk.msra.mxu1 %vm113_vm0, %v82_v48  ;;  %v1759_v48 = vld [vmem:[%s3055_s11 + $0x1] ss:$0 sm:$0xff] }
  0x45   :  { %2013 = vmatprep.subr.mxu1 %v2216_v3 }
  0x47   :  { %2023 = vmatpush3.xpose.msk.msra.mxu0 %vm113_vm0, %v406_v49 }
  0x48   :  { %2024 = vmatprep.subr.mxu0 %v2216_v3  ;;  %2014 = vmatpush3.xpose.msk.msra.mxu1 %vm113_vm0, %v81_v50 }
  0x49   :  { %2015 = vmatprep.subr.mxu1 %v2216_v3 }
  0x4b   :  { %2025 = vmatpush3.xpose.msk.msra.mxu0 %vm113_vm0, %v405_v51 }
  0x4c   :  { %2026 = vmatprep.subr.mxu0 %v2216_v3  ;;  %2016 = vmatpush3.xpose.msk.msra.mxu1 %vm113_vm0, %v80_v52 }
  0x4d   :  { %2035 = vmatprep.subr.mxu1 %v2216_v3 }
  0x4f   :  { %2027 = vmatpush3.xpose.msk.msra.mxu0 %vm113_vm0, %v404_v53  ;;  %2018 = vmatmul.mubr.msk.f32.vlgmr.msra.gmra.mxu1 %vm113_vm0, %v2327_v8 }
  0x50   :  { %2028 = vmatprep.subr.mxu0 %v2216_v3  ;;  %2036 = vmatpush3.xpose.msk.msra.mxu1 %vm518_vm2, %v512_v54 }
  0x51   :  { %2037 = vmatprep.subr.mxu1 %v2216_v3  ;;  %2059 = vmatprep.mubr.msk.f32.mxu1 %vm2217_vm1, %v2216_v3 }
  0x53   :  { %2029 = vmatpush3.xpose.msk.msra.mxu0 %vm113_vm0, %v403_v55 }
  0x54   :  { %2030 = vmatprep.subr.mxu0 %v2216_v3  ;;  %2038 = vmatpush3.xpose.msk.msra.mxu1 %vm518_vm2, %v511_v56 }
  0x55   :  { %2039 = vmatprep.subr.mxu1 %v2216_v3 }
  0x57   :  { %2031 = vmatpush3.xpose.msk.msra.mxu0 %vm113_vm0, %v402_v57 }
  0x58   :  { %2062 = vmatprep.subr.mxu0 %v2216_v3  ;;  %2040 = vmatpush3.xpose.msk.msra.mxu1 %vm518_vm2, %v510_v58 }
  0x59   :  { %2041 = vmatprep.subr.mxu1 %v2216_v3 }
  0x5a   :  { %2033 = vmatmul.mubr.msk.f32.vlgmr.msra.gmra.mxu0 %vm113_vm0, %v2327_v8  ;;  %v502_v8 = vld [vmem:[%s3050_s6 + $0x8] sm:$0xff] }
  0x5b   :  { %2063 = vmatpush3.xpose.msk.msra.mxu0 %vm113_vm0, %v631_v59  ;;  %2070 = vmatprep.mubr.msk.f32.mxu0 %vm2217_vm1, %v2216_v3 }
  0x5c   :  { %2064 = vmatprep.subr.mxu0 %v2216_v3  ;;  %2042 = vmatpush3.xpose.msk.msra.mxu1 %vm518_vm2, %v509_v60 }
  0x5d   :  { %2043 = vmatprep.subr.mxu1 %v2216_v3 }
  0x5f   :  { %2065 = vmatpush3.xpose.msk.msra.mxu0 %vm113_vm0, %v630_v61 }
  0x60   :  { %2066 = vmatprep.subr.mxu0 %v2216_v3  ;;  %2044 = vmatpush3.xpose.msk.msra.mxu1 %vm518_vm2, %v508_v62 }
  0x61   :  { %2045 = vmatprep.subr.mxu1 %v2216_v3 }
  0x63   :  { %2067 = vmatpush3.xpose.msk.msra.mxu0 %vm113_vm0, %v629_v63 }
  0x64   :  { %2068 = vmatprep.subr.mxu0 %v2216_v3  ;;  %2046 = vmatpush3.xpose.msk.msra.mxu1 %vm518_vm2, %v507_v2 }
  0x65   :  { %2047 = vmatprep.subr.mxu1 %v2216_v3 }
  0x67   :  { %2069 = vmatpush3.xpose.msk.msra.mxu0 %vm113_vm0, %v628_v0 }
  0x68   :  { %2073 = vmatprep.subr.mxu0 %v2216_v3  ;;  %2048 = vmatpush3.xpose.msk.msra.mxu1 %vm518_vm2, %v506_v4 }
  0x69   :  { %2049 = vmatprep.subr.mxu1 %v2216_v3 }
  0x6a   :  { %2071 = vmatmul.mubr.msk.f32.vlgmr.msra.gmra.mxu0 %vm113_vm0, %v46_v1 }
  0x6b   :  { %2081 = vmatprep.mubr.msk.f32.mxu0 %vm2217_vm1, %v2216_v3  ;;  %2074 = vmatpush3.xpose.msk.msra.mxu0 %vm752_vm5, %v746_v31 }
  0x6c   :  { %2050 = vmatpush3.xpose.msk.msra.mxu1 %vm518_vm2, %v505_v5  ;;  %2075 = vmatprep.subr.mxu0 %v2216_v3 }
  0x6d   :  { %2051 = vmatprep.subr.mxu1 %v2216_v3 }
  0x6f   :  { %2076 = vmatpush3.xpose.msk.msra.mxu0 %vm752_vm5, %v745_v32 }
  0x70   :  { %2052 = vmatpush3.xpose.msk.msra.mxu1 %vm518_vm2, %v504_v6  ;;  %2077 = vmatprep.subr.mxu0 %v2216_v3 }
  0x71   :  { %2053 = vmatprep.subr.mxu1 %v2216_v3 }
  0x73   :  { %2078 = vmatpush3.xpose.msk.msra.mxu0 %vm752_vm5, %v744_v33 }
  0x74   :  { %2054 = vmatpush3.xpose.msk.msra.mxu1 %vm518_vm2, %v503_v7  ;;  %2079 = vmatprep.subr.mxu0 %v2216_v3 }
  0x75   :  { %2055 = vmatprep.subr.mxu1 %v2216_v3 }
  0x77   :  { %2080 = vmatpush3.xpose.msk.msra.mxu0 %vm752_vm5, %v743_v34 }
  0x78   :  { %2056 = vmatpush3.xpose.msk.msra.mxu1 %vm518_vm2, %v502_v8  ;;  %2095 = vmatprep.subr.mxu0 %v2216_v3 }
  0x79   :  { %2057 = vmatprep.subr.mxu1 %v2216_v3 }
  0x7c   :  { %2058 = vmatpush3.xpose.msk.msra.mxu1 %vm518_vm2, %v501_v9 }
  0x7d   :  { %2084 = vmatprep.subr.mxu1 %v2216_v3 }
 0x102   :  { %v2641_v10 = vpop.f32.mrf.mxu0 }
 0x104   :  { %v2643_v11 = vpop.f32.mrf.mxu0 }
 0x10f   :  { %v2655_v22 = vpop.f32.mrf.mxu1 }
 0x111   :  { %v2019_v23 = vpop.f32.mrf.mxu1 }
 0x11a   :  { %v497_v13 = vpop.f32.mrf.mxu0 }
 0x11b   :  { %v498_v14 = vadd.f32 %v1731_v12, %v497_v13  ;;  %v98_v13 = vlaneseq }
 0x11c   :  { %v2034_v15 = vpop.f32.mrf.mxu0 }
 0x11d   :  { %2060 = vmatmul.mubr.msk.f32.vlgmr.msra.gmra.mxu1 %vm518_vm2, %v498_v14  ;;  %v2715_v14 = vshrl.u32 %v98_v13, 7  ;;  %v841_v15 = vld [vmem:[%s3055_s11 + $0x2] sm:$0x1] }
 0x11e   :  { %2092 = vmatprep.mubr.msk.f32.mxu1 %vm2217_vm1, %v2216_v3  ;;  %2085 = vmatpush3.xpose.msk.msra.mxu1 %vm882_vm6, %v881_v44 }
 0x11f   :  { %2086 = vmatprep.subr.mxu1 %v2216_v3 }
 0x122   :  { %2087 = vmatpush3.xpose.msk.msra.mxu1 %vm882_vm6, %v880_v45 }
 0x123   :  { %2088 = vmatprep.subr.mxu1 %v2216_v3 }
 0x126   :  { %2089 = vmatpush3.xpose.msk.msra.mxu1 %vm882_vm6, %v879_v46 }
 0x127   :  { %2090 = vmatprep.subr.mxu1 %v2216_v3 }
 0x12a   :  { %v718_v17 = vpop.f32.mrf.mxu0  ;;  %2091 = vmatpush3.xpose.msk.msra.mxu1 %vm882_vm6, %v878_v47 }
 0x12b   :  { %v719_v18 = vadd.f32 %v1753_v16, %v718_v17  ;;  %2106 = vmatprep.subr.mxu1 %v2216_v3  ;;  %v2721_v17 = vsub.s32 0, %v2715_v14 }
 0x12c   :  { %v2072_v19 = vpop.f32.mrf.mxu0 }
 0x12d   :  { %v724_v20 = vmul.f32 0.5, %v719_v18  ;;  %723 = vst.msk [vmem:[#allocation4] sm:$0xf] %vm722_vm3, %v719_v18  ;;  %v842_v19 = vld [vmem:[%s3055_s11 + $0x3] sm:$0x1] }
 0x12f   :  { %v725_v21 = vmul.f32 1.442695, %v724_v20 }
 0x131   :  { %2160 = vpow2.f32 %v725_v21 }
 0x13e   :  { %v2161_v24 = vpop.eup %2160 }
 0x13f   :  { %728 = vrot.lane.b32.xlu0 %v2161_v24, %s2218_s23 }
 0x1b1   :  { %v729_v26 = vpop.permute.xlu0 %728 }
 0x1b2   :  { %v731_v27 = vmul.f32 %v729_v26, %v47_v25 }
 0x1b4   :  { %v732_v28 = vadd.f32 %v731_v27, %v719_v18  ;;  %v1773_v27 = vld [vmem:[%s3051_s7 + $0x38] sm:$0xff] }
 0x1b6   :  { %v733_v29 = vmul.f32 %v732_v28, %v732_v28 }
 0x1b8   :  { %v735_v30 = vsel %vm734_vm4, %v733_v29, 0.0  ;;  %v1771_v29 = vld [vmem:[%s3051_s7 + $0x28] sm:$0xff] }
 0x1b9   :  { %736 = vadd.xlane.f32.xlu0 %v735_v30  ;;  %v1770_v30 = vld [vmem:[%s3051_s7 + $0x20] sm:$0xff] }
 0x1dd   :  { %v624_v36 = vpop.f32.mrf.mxu1 }
 0x1de   :  { %v2683_v37 = vadd.f32 %v1739_v35, %v624_v36 }
 0x1df   :  { %v2061_v38 = vpop.f32.mrf.mxu1 }
 0x1e0   :  { %1013 = vrot.lane.b32.xlu1 %v2683_v37, %s2219_s14 }
 0x242   :  { %v737_v39 = vpop.xlane.xlu0 %736 }
 0x243   :  { %v739_v40 = vmul.f32 0.0625, %v737_v39 }
 0x245   :  { %v740_v41 = vadd.f32 1e-08, %v739_v40 }
 0x247   :  { %2162 = vrsqrt.f32 %v740_v41 }
 0x254   :  { %v2163_v42 = vpop.eup %2162 }
 0x255   :  { %v742_v43 = vmul.f32 %v2163_v42, %v732_v28  ;;  %v1772_v28 = vld [vmem:[%s3051_s7 + $0x30] sm:$0xff] }
 0x257   :  { %2082 = vmatmul.mubr.msk.f32.vlgmr.msra.gmra.mxu0 %vm752_vm5, %v742_v43 }
 0x258   :  { %2103 = vmatprep.mubr.msk.f32.mxu0 %vm2217_vm1, %v2216_v3  ;;  %2096 = vmatpush3.xpose.msk.msra.mxu0 %vm882_vm6, %v1773_v27 }
 0x259   :  { %2097 = vmatprep.subr.mxu0 %v2216_v3 }
 0x25c   :  { %2098 = vmatpush3.xpose.msk.msra.mxu0 %vm882_vm6, %v1772_v28 }
 0x25d   :  { %2099 = vmatprep.subr.mxu0 %v2216_v3 }
 0x260   :  { %2100 = vmatpush3.xpose.msk.msra.mxu0 %vm882_vm6, %v1771_v29 }
 0x261   :  { %2101 = vmatprep.subr.mxu0 %v2216_v3 }
 0x264   :  { %2102 = vmatpush3.xpose.msk.msra.mxu0 %vm882_vm6, %v1770_v30 }
 0x317   :  { %v834_v49 = vpop.f32.mrf.mxu0 }
 0x318   :  { %v835_v50 = vadd.f32 %v1759_v48, %v834_v49 }
 0x319   :  { %v2083_v51 = vpop.f32.mrf.mxu0 }
 0x31a   :  { %vm838_vm7 = vcmp.gt.f32.partialorder %v835_v50, 0.0  ;;  %v839_v52 = vmul.f32 0.2, %v835_v50 }
 0x31c   :  { %v840_v53 = vsel %vm838_vm7, %v835_v50, %v839_v52 }
 0x31d   :  { %v843_v54 = vsel %vm722_vm3, %v840_v53, 0.0  ;;  %v852_v55 = vmul.f32 %v840_v53, %v840_v53 }
 0x31e   :  { %v844_v56 = vrot.slane %v843_v54, 4 }
 0x31f   :  { %v853_v57 = vsel %vm722_vm3, %v852_v55, 0.0 }
 0x320   :  { %v845_v58 = vadd.f32 %v844_v56, %v843_v54  ;;  %v854_v59 = vrot.slane %v853_v57, 4 }
 0x322   :  { %v846_v60 = vrot.slane %v845_v58, 2  ;;  %v855_v61 = vadd.f32 %v854_v59, %v853_v57  ;;  %v2756_v57 = vld [vmem:[%s3055_s11 + $0x6] sm:$0x1] }
 0x324   :  { %v847_v62 = vadd.f32 %v846_v60, %v845_v58  ;;  %v856_v63 = vrot.slane %v855_v61, 2  ;;  %v2762_v60 = vld [vmem:[%s3055_s11 + $0x7] sm:$0x1]  ;;  %s2220_s11 = smov 32  }
 0x326   :  { %v848_v0 = vrot.slane %v847_v62, 1  ;;  %v857_v1 = vadd.f32 %v856_v63, %v855_v61 }
 0x328   :  { %v849_v2 = vadd.f32 %v848_v0, %v847_v62  ;;  %v858_v4 = vrot.slane %v857_v1, 1 }
 0x32a   :  { %v851_v5 = vmul.f32 0.25, %v849_v2  ;;  %v859_v6 = vadd.f32 %v858_v4, %v857_v1  ;;  %v1014_v4 = vpop.permute.xlu1 %1013 }
 0x32c   :  { %v860_v7 = vmul.f32 0.25, %v859_v6  ;;  %v861_v8 = vmul.f32 %v851_v5, %v851_v5 }
 0x32e   :  { %v862_v9 = vsub.f32 %v860_v7, %v861_v8 }
 0x330   :  { %v863_v12 = vadd.f32 1e-05, %v862_v9 }
 0x332   :  { %2164 = vrsqrt.f32 %v863_v12 }
 0x33f   :  { %v2165_v16 = vpop.eup %2164 }
 0x340   :  { %v865_v18 = vmul.f32 %v2165_v16, %v841_v15 }
 0x342   :  { %v869_v20 = vrot.slane %v865_v18, %v2721_v17  ;;  %v871_v21 = vmul.f32 %v865_v18, %v851_v5 }
 0x344   :  { %v872_v23 = vsub.f32 %v842_v19, %v871_v21  ;;  %v870_v24 = vmul.f32 %v869_v20, %v840_v53 }
 0x346   :  { %v876_v25 = vrot.slane %v872_v23, %v2721_v17 }
 0x348   :  { %v877_v26 = vadd.f32 %v876_v25, %v870_v24 }
 0x34a   :  { %2093 = vmatmul.mubr.msk.f32.vlgmr.msra.gmra.mxu1 %vm882_vm6, %v877_v26 }
 0x34b   :  { %2114 = vmatprep.mubr.msk.f32.mxu1 %vm2217_vm1, %v2216_v3 }
 0x40a   :  { %v964_v31 = vpop.f32.mrf.mxu1 }
 0x40b   :  { %v965_v32 = vadd.f32 %v964_v31, %v2683_v37 }
 0x40c   :  { %v2094_v33 = vpop.f32.mrf.mxu1 }
 0x40d   :  { %vm968_vm8 = vcmp.gt.f32.partialorder %v965_v32, 0.0  ;;  %v969_v34 = vmul.f32 0.2, %v965_v32 }
 0x40f   :  { %v970_v35 = vsel %vm968_vm8, %v965_v32, %v969_v34 }
 0x410   :  { %v973_v36 = vsel %vm722_vm3, %v970_v35, 0.0  ;;  %v981_v38 = vmul.f32 %v970_v35, %v970_v35 }
 0x411   :  { %v974_v39 = vrot.slane %v973_v36, 4 }
 0x412   :  { %v982_v40 = vsel %vm722_vm3, %v981_v38, 0.0 }
 0x413   :  { %v975_v41 = vadd.f32 %v974_v39, %v973_v36  ;;  %v983_v42 = vrot.slane %v982_v40, 4  ;;  %v1782_v39 = vld [vmem:[%s3051_s7 + $0x58] sm:$0xff] }
 0x414   :  { %2107 = vmatpush3.xpose.msk.msra.mxu1 %vm882_vm6, %v1782_v39  ;;  %v1320_v39 = vld [vmem:[%s3052_s8 + $0x60] sm:$0xff] }
 0x415   :  { %v976_v43 = vrot.slane %v975_v41, 2  ;;  %v984_v44 = vadd.f32 %v983_v42, %v982_v40  ;;  %2108 = vmatprep.subr.mxu1 %v2216_v3 }
 0x417   :  { %v977_v45 = vadd.f32 %v976_v43, %v975_v41  ;;  %v985_v46 = vrot.slane %v984_v44, 2  ;;  %v1781_v41 = vld [vmem:[%s3051_s7 + $0x50] sm:$0xff]  ;;  %v1780_v43 = vld [vmem:[%s3051_s7 + $0x48] sm:$0xff] }
 0x418   :  { %2109 = vmatpush3.xpose.msk.msra.mxu1 %vm882_vm6, %v1781_v41  ;;  %v1351_v41 = vld [vmem:[%s3052_s8 + $0x158] sm:$0xff] }
 0x419   :  { %v978_v47 = vrot.slane %v977_v45, 1  ;;  %v986_v48 = vadd.f32 %v985_v46, %v984_v44  ;;  %2110 = vmatprep.subr.mxu1 %v2216_v3 }
 0x41b   :  { %v979_v49 = vadd.f32 %v978_v47, %v977_v45  ;;  %v987_v50 = vrot.slane %v986_v48, 1  ;;  %v1779_v45 = vld [vmem:[%s3051_s7 + $0x40] sm:$0xff] }
 0x41c   :  { %2111 = vmatpush3.xpose.msk.msra.mxu1 %vm882_vm6, %v1780_v43  ;;  %v1334_v43 = vld [vmem:[%s3052_s8 + $0xd0] sm:$0xff] }
 0x41d   :  { %v980_v51 = vmul.f32 0.25, %v979_v49  ;;  %v988_v52 = vadd.f32 %v987_v50, %v986_v48  ;;  %2112 = vmatprep.subr.mxu1 %v2216_v3 }
 0x41f   :  { %v989_v53 = vmul.f32 0.25, %v988_v52  ;;  %v990_v54 = vmul.f32 %v980_v51, %v980_v51 }
 0x420   :  { %2113 = vmatpush3.xpose.msk.msra.mxu1 %vm882_vm6, %v1779_v45  ;;  %v1318_v45 = vld [vmem:[%s3052_s8 + $0x50] sm:$0xff] }
 0x421   :  { %v991_v55 = vsub.f32 %v989_v53, %v990_v54  ;;  %2117 = vmatprep.subr.mxu1 %v2216_v3 }
 0x423   :  { %v992_v56 = vadd.f32 1e-05, %v991_v55 }
 0x425   :  { %2166 = vrsqrt.f32 %v992_v56 }
 0x432   :  { %v2167_v58 = vpop.eup %2166 }
 0x433   :  { %v994_v59 = vmul.f32 %v2167_v58, %v2756_v57 }
 0x435   :  { %v998_v61 = vrot.slane %v994_v59, %v2721_v17  ;;  %v1000_v62 = vmul.f32 %v994_v59, %v980_v51 }
 0x437   :  { %v1001_v63 = vsub.f32 %v2762_v60, %v1000_v62  ;;  %v999_v0 = vmul.f32 %v998_v61, %v970_v35 }
 0x439   :  { %v1005_v1 = vrot.slane %v1001_v63, %v2721_v17 }
 0x43b   :  { %v1006_v2 = vadd.f32 %v1005_v1, %v999_v0 }
 0x43d   :  { %2104 = vmatmul.mubr.msk.f32.vlgmr.msra.gmra.mxu0 %vm882_vm6, %v1006_v2 }
 0x4fd   :  { %v1097_v5 = vpop.f32.mrf.mxu0 }
 0x4fe   :  { %v1098_v6 = vadd.f32 %v1097_v5, %v1014_v4 }
 0x4ff   :  { %v2105_v7 = vpop.f32.mrf.mxu0 }
 0x500   :  { %vm1101_vm9 = vcmp.gt.f32.partialorder %v1098_v6, 0.0  ;;  %v1102_v8 = vmul.f32 0.2, %v1098_v6 }
 0x502   :  { %v1103_v9 = vsel %vm1101_vm9, %v1098_v6, %v1102_v8 }
 0x503   :  { %v1104_v12 = vsel %vm722_vm3, %v1103_v9, 0.0  ;;  %v1112_v13 = vmul.f32 %v1103_v9, %v1103_v9 }
 0x504   :  { %v1105_v15 = vrot.slane %v1104_v12, 4 }
 0x505   :  { %v1113_v16 = vsel %vm722_vm3, %v1112_v13, 0.0 }
 0x506   :  { %v1106_v18 = vadd.f32 %v1105_v15, %v1104_v12  ;;  %v1114_v19 = vrot.slane %v1113_v16, 4 }
 0x508   :  { %v1107_v20 = vrot.slane %v1106_v18, 2  ;;  %v1115_v21 = vadd.f32 %v1114_v19, %v1113_v16 }
 0x50a   :  { %v1108_v23 = vadd.f32 %v1107_v20, %v1106_v18  ;;  %v1116_v24 = vrot.slane %v1115_v21, 2 }
 0x50c   :  { %v1109_v25 = vrot.slane %v1108_v23, 1  ;;  %v1117_v26 = vadd.f32 %v1116_v24, %v1115_v21 }
 0x50e   :  { %v1110_v27 = vadd.f32 %v1109_v25, %v1108_v23  ;;  %v1118_v28 = vrot.slane %v1117_v26, 1 }
 0x510   :  { %v1111_v29 = vmul.f32 0.25, %v1110_v27  ;;  %v1119_v30 = vadd.f32 %v1118_v28, %v1117_v26  ;;  %v1339_v26 = vld [vmem:[%s3052_s8 + $0xf8] sm:$0xff] }
 0x511   :  { %v1355_v27 = vld [vmem:[%s3052_s8 + $0x178] sm:$0xff]  ;;  %1934 = vmatprep.subr.msk.mxu0 %vm882_vm6, %v1339_v26 }
 0x512   :  { %v1120_v31 = vmul.f32 0.25, %v1119_v30  ;;  %v1121_v32 = vmul.f32 %v1111_v29, %v1111_v29  ;;  %v1323_v28 = vld [vmem:[%s3052_s8 + $0x78] sm:$0xff]  ;;  %v1322_v30 = vld [vmem:[%s3052_s8 + $0x70] sm:$0xff] }
 0x513   :  { %1935 = vmatpush3.xpose.msk.msra.mxu0 %vm882_vm6, %v1323_v28 }
 0x514   :  { %v1122_v33 = vsub.f32 %v1120_v31, %v1121_v32  ;;  %v1337_v31 = vld [vmem:[%s3052_s8 + $0xe8] sm:$0xff] }
 0x516   :  { %v1123_v34 = vadd.f32 1e-05, %v1122_v33  ;;  %v1353_v33 = vld [vmem:[%s3052_s8 + $0x168] sm:$0xff] }
 0x518   :  { %2168 = vrsqrt.f32 %v1123_v34 }
 0x525   :  { %v2169_v35 = vpop.eup %2168 }
 0x526   :  { %1126 = vrot.lane.b32.xlu1 %v2169_v35, %s2220_s11  ;;  %v1321_v35 = vld [vmem:[%s3052_s8 + $0x68] sm:$0xff] }
 0x598   :  { %v1127_v36 = vpop.permute.xlu1 %1126 }
 0x599   :  { %v1129_v38 = vmul.f32 %v1127_v36, %v2756_v57  ;;  %v1336_v36 = vld [vmem:[%s3052_s8 + $0xe0] sm:$0xff] }
 0x59b   :  { %1140 = vrot.lane.b32.xlu1 %v1129_v38, %s2219_s14  ;;  %v1133_v44 = vrot.slane %v1129_v38, %v2721_v17  ;;  %v1352_v38 = vld [vmem:[%s3052_s8 + $0x160] sm:$0xff] }
 0x60d   :  { %v1141_v40 = vpop.permute.xlu1 %1140 }
 0x60e   :  { %v1143_v42 = vmul.f32 %v1141_v40, %v1111_v29  ;;  %v1354_v29 = vld [vmem:[%s3052_s8 + $0x170] sm:$0xff]  ;;  %v1335_v40 = vld [vmem:[%s3052_s8 + $0xd8] sm:$0xff] }
 0x610   :  { %1145 = vrot.lane.b32.xlu1 %v1143_v42, %s2220_s11  ;;  %v1319_v42 = vld [vmem:[%s3052_s8 + $0x58] sm:$0xff] }
 0x614   :  { %1135 = vrot.lane.b32.xlu1 %v1133_v44, %s2219_s14  ;;  %v1350_v44 = vld [vmem:[%s3052_s8 + $0x150] sm:$0xff] }
 0x682   :  { %v1146_v46 = vpop.permute.xlu1 %1145 }
 0x683   :  { %v1148_v47 = vsub.f32 %v2762_v60, %v1146_v46  ;;  %v1333_v46 = vld [vmem:[%s3052_s8 + $0xc8] sm:$0xff] }
 0x685   :  { %v1152_v48 = vrot.slane %v1148_v47, %v2721_v17  ;;  %v1349_v47 = vld [vmem:[%s3052_s8 + $0x148] sm:$0xff] }
 0x686   :  { %v1136_v49 = vpop.permute.xlu1 %1135 }
 0x687   :  { %1154 = vrot.lane.b32.xlu1 %v1152_v48, %s2219_s14  ;;  %v1138_v50 = vmul.f32 %v1136_v49, %v1103_v9  ;;  %v1317_v48 = vld [vmem:[%s3052_s8 + $0x48] sm:$0xff]  ;;  %v1332_v49 = vld [vmem:[%s3052_s8 + $0xc0] sm:$0xff] }
 0x68b   :  { %1163 = vrot.lane.b32.xlu1 %v2683_v37, %s2221_s22 }
 0x6f9   :  { %v1155_v51 = vpop.permute.xlu1 %1154 }
 0x6fa   :  { %v1157_v52 = vadd.f32 %v1155_v51, %v1138_v50  ;;  %v1348_v50 = vld [vmem:[%s3052_s8 + $0x140] sm:$0xff] }
 0x6fb   :  { %v1316_v51 = vld [vmem:[%s3052_s8 + $0x40] sm:$0xff] }
 0x6fc   :  { %2115 = vmatmul.mubr.msk.f32.vlgmr.msra.gmra.mxu1 %vm882_vm6, %v1157_v52  ;;  %v1331_v52 = vld [vmem:[%s3052_s8 + $0xb8] sm:$0xff] }
 0x6fd   :  { %2149 = vmatprep.mubr.msk.f32.mxu1 %vm2217_vm1, %v2216_v3  ;;  %v1164_v53 = vpop.permute.xlu1 %1163  ;;  %2118 = vmatpush3.xpose.msk.msra.mxu1 %vm882_vm6, %v1355_v27 }
 0x6fe   :  { %2119 = vmatprep.subr.mxu1 %v2216_v3 }
 0x701   :  { %2120 = vmatpush3.xpose.msk.msra.mxu1 %vm882_vm6, %v1354_v29 }
 0x702   :  { %2121 = vmatprep.subr.mxu1 %v2216_v3 }
 0x705   :  { %2122 = vmatpush3.xpose.msk.msra.mxu1 %vm882_vm6, %v1353_v33 }
 0x706   :  { %2123 = vmatprep.subr.mxu1 %v2216_v3 }
 0x709   :  { %2124 = vmatpush3.xpose.msk.msra.mxu1 %vm882_vm6, %v1352_v38 }
 0x70a   :  { %2125 = vmatprep.subr.mxu1 %v2216_v3 }
 0x70d   :  { %2126 = vmatpush3.xpose.msk.msra.mxu1 %vm882_vm6, %v1351_v41 }
 0x70e   :  { %2127 = vmatprep.subr.mxu1 %v2216_v3 }
 0x711   :  { %2128 = vmatpush3.xpose.msk.msra.mxu1 %vm882_vm6, %v1350_v44 }
 0x712   :  { %2129 = vmatprep.subr.mxu1 %v2216_v3 }
 0x715   :  { %2130 = vmatpush3.xpose.msk.msra.mxu1 %vm882_vm6, %v1349_v47 }
 0x716   :  { %2131 = vmatprep.subr.mxu1 %v2216_v3 }
 0x719   :  { %2132 = vmatpush3.xpose.msk.msra.mxu1 %vm882_vm6, %v1348_v50 }
 0x71a   :  { %2133 = vmatprep.subr.mxu1 %v2216_v3 }
 0x7bc   :  { %v1247_v54 = vpop.f32.mrf.mxu1 }
 0x7bd   :  { %v1248_v55 = vadd.f32 %v1247_v54, %v1164_v53  ;;  %v1347_v53 = vld [vmem:[%s3052_s8 + $0x138] sm:$0xff] }
 0x7be   :  { %v2116_v56 = vpop.f32.mrf.mxu1  ;;  %v1315_v54 = vld [vmem:[%s3052_s8 + $0x38] sm:$0xff]  ;;  %2134 = vmatpush3.xpose.msk.msra.mxu1 %vm882_vm6, %v1347_v53 }
 0x7bf   :  { %vm1251_vm10 = vcmp.gt.f32.partialorder %v1248_v55, 0.0  ;;  %v1252_v58 = vmul.f32 0.2, %v1248_v55  ;;  %2135 = vmatprep.subr.mxu1 %v2216_v3  ;;  %v1346_v56 = vld [vmem:[%s3052_s8 + $0x130] sm:$0xff] }
 0x7c1   :  { %v2802_v59 = vsel %vm1251_vm10, %v1248_v55, %v1252_v58  ;;  %v1330_v55 = vld [vmem:[%s3052_s8 + $0xb0] sm:$0xff] }
 0x7c2   :  { %v1254_v37 = vsel %vm722_vm3, %v2802_v59, 0.0  ;;  %v1262_v61 = vmul.f32 %v2802_v59, %v2802_v59  ;;  %v1314_v58 = vld [vmem:[%s3052_s8 + $0x30] sm:$0xff]  ;;  %2136 = vmatpush3.xpose.msk.msra.mxu1 %vm882_vm6, %v1346_v56 }
 0x7c3   :  { %v1255_v62 = vrot.slane %v1254_v37, 4  ;;  %2137 = vmatprep.subr.mxu1 %v2216_v3 }
 0x7c4   :  { %v1263_v63 = vsel %vm722_vm3, %v1262_v61, 0.0  ;;  %v1345_v61 = vld [vmem:[%s3052_s8 + $0x128] sm:$0xff] }
 0x7c5   :  { %v1256_v0 = vadd.f32 %v1255_v62, %v1254_v37  ;;  %v1264_v1 = vrot.slane %v1263_v63, 4  ;;  %v1329_v37 = vld [vmem:[%s3052_s8 + $0xa8] sm:$0xff] }
 0x7c6   :  { %v1313_v62 = vld [vmem:[%s3052_s8 + $0x28] sm:$0xff]  ;;  %2138 = vmatpush3.xpose.msk.msra.mxu1 %vm882_vm6, %v1345_v61 }
 0x7c7   :  { %v1257_v2 = vrot.slane %v1256_v0, 2  ;;  %v1265_v4 = vadd.f32 %v1264_v1, %v1263_v63  ;;  %v1328_v63 = vld [vmem:[%s3052_s8 + $0xa0] sm:$0xff]  ;;  %2139 = vmatprep.subr.mxu1 %v2216_v3 }
 0x7c8   :  { %v1312_v1 = vld [vmem:[%s3052_s8 + $0x20] sm:$0xff] }
 0x7c9   :  { %v1258_v5 = vadd.f32 %v1257_v2, %v1256_v0  ;;  %v1266_v6 = vrot.slane %v1265_v4, 2  ;;  %v1344_v0 = vld [vmem:[%s3052_s8 + $0x120] sm:$0xff]  ;;  %v1327_v2 = vld [vmem:[%s3052_s8 + $0x98] sm:$0xff] }
 0x7ca   :  { %2140 = vmatpush3.xpose.msk.msra.mxu1 %vm882_vm6, %v1344_v0 }
 0x7cb   :  { %v1259_v7 = vrot.slane %v1258_v5, 1  ;;  %v1267_v8 = vadd.f32 %v1266_v6, %v1265_v4  ;;  %2141 = vmatprep.subr.mxu1 %v2216_v3  ;;  %v1343_v4 = vld [vmem:[%s3052_s8 + $0x118] sm:$0xff]  ;;  %v1326_v6 = vld [vmem:[%s3052_s8 + $0x90] sm:$0xff] }
 0x7cd   :  { %v1260_v9 = vadd.f32 %v1259_v7, %v1258_v5  ;;  %v1268_v12 = vrot.slane %v1267_v8, 1  ;;  %v1311_v5 = vld [vmem:[%s3052_s8 + $0x18] sm:$0xff]  ;;  %v1342_v7 = vld [vmem:[%s3052_s8 + $0x110] sm:$0xff] }
 0x7ce   :  { %2142 = vmatpush3.xpose.msk.msra.mxu1 %vm882_vm6, %v1343_v4 }
 0x7cf   :  { %v1261_v13 = vmul.f32 0.25, %v1260_v9  ;;  %v1269_v15 = vadd.f32 %v1268_v12, %v1267_v8  ;;  %2143 = vmatprep.subr.mxu1 %v2216_v3  ;;  %v1310_v8 = vld [vmem:[%s3052_s8 + $0x10] sm:$0xff]  ;;  %v1325_v9 = vld [vmem:[%s3052_s8 + $0x88] sm:$0xff] }
 0x7d0   :  { %v1341_v12 = vld [vmem:[%s3052_s8 + $0x108] sm:$0xff] }
 0x7d1   :  { %v1270_v16 = vmul.f32 0.25, %v1269_v15  ;;  %v1271_v18 = vmul.f32 %v1261_v13, %v1261_v13  ;;  %v1324_v15 = vld [vmem:[%s3052_s8 + $0x80] sm:$0xff] }
 0x7d2   :  { %2144 = vmatpush3.xpose.msk.msra.mxu1 %vm882_vm6, %v1342_v7 }
 0x7d3   :  { %v1272_v19 = vsub.f32 %v1270_v16, %v1271_v18  ;;  %2145 = vmatprep.subr.mxu1 %v2216_v3  ;;  %v1340_v16 = vld [vmem:[%s3052_s8 + $0x100] sm:$0xff] }
 0x7d4   :  { %v1308_v18 = vld [vmem:[%s3052_s8] sm:$0xff] }
 0x7d5   :  { %v1273_v20 = vadd.f32 1e-05, %v1272_v19 }
 0x7d6   :  { %2146 = vmatpush3.xpose.msk.msra.mxu1 %vm882_vm6, %v1341_v12 }
 0x7d7   :  { %2170 = vrsqrt.f32 %v1273_v20  ;;  %2147 = vmatprep.subr.mxu1 %v2216_v3 }
 0x7da   :  { %2148 = vmatpush3.xpose.msk.msra.mxu1 %vm882_vm6, %v1340_v16 }
 0x7e4   :  { %v2171_v21 = vpop.eup %2170 }
 0x7e5   :  { %1276 = vrot.lane.b32.xlu1 %v2171_v21, %s2221_s22 }
 0x857   :  { %v1277_v23 = vpop.permute.xlu1 %1276 }
 0x858   :  { %v1279_v24 = vmul.f32 %v1277_v23, %v2756_v57  ;;  %v1338_v57 = vld [vmem:[%s3052_s8 + $0xf0] sm:$0xff] }
 0x859   :  { %1936 = vmatprep.subr.msk.mxu0 %vm882_vm6, %v1338_v57 }
 0x85a   :  { %1290 = vrot.lane.b32.xlu1 %v1279_v24, %s2221_s22  ;;  %v1283_v25 = vrot.slane %v1279_v24, %v2721_v17  ;;  %1937 = vmatpush3.xpose.msk.msra.mxu0 %vm882_vm6, %v1322_v30 }
 0x85b   :  { %1938 = vmatprep.subr.msk.mxu0 %vm882_vm6, %v1337_v31 }
 0x85e   :  { %1285 = vrot.lane.b32.xlu1 %v1283_v25, %s2221_s22  ;;  %1939 = vmatpush3.xpose.msk.msra.mxu0 %vm882_vm6, %v1321_v35 }
 0x85f   :  { %1940 = vmatprep.subr.msk.mxu0 %vm882_vm6, %v1336_v36 }
 0x862   :  { %1941 = vmatpush3.xpose.msk.msra.mxu0 %vm882_vm6, %v1320_v39 }
 0x863   :  { %1942 = vmatprep.subr.msk.mxu0 %vm882_vm6, %v1335_v40 }
 0x866   :  { %1943 = vmatpush3.xpose.msk.msra.mxu0 %vm882_vm6, %v1319_v42 }
 0x867   :  { %1944 = vmatprep.subr.msk.mxu0 %vm882_vm6, %v1334_v43 }
 0x86a   :  { %1945 = vmatpush3.xpose.msk.msra.mxu0 %vm882_vm6, %v1318_v45 }
 0x86b   :  { %1946 = vmatprep.subr.msk.mxu0 %vm882_vm6, %v1333_v46 }
 0x86e   :  { %1947 = vmatpush3.xpose.msk.msra.mxu0 %vm882_vm6, %v1317_v48 }
 0x86f   :  { %1948 = vmatprep.subr.msk.mxu0 %vm882_vm6, %v1332_v49 }
 0x872   :  { %1949 = vmatpush3.xpose.msk.msra.mxu0 %vm882_vm6, %v1316_v51 }
 0x873   :  { %1950 = vmatprep.subr.msk.mxu0 %vm882_vm6, %v1331_v52 }
 0x876   :  { %1951 = vmatpush3.xpose.msk.msra.mxu0 %vm882_vm6, %v1315_v54 }
 0x877   :  { %1952 = vmatprep.subr.msk.mxu0 %vm882_vm6, %v1330_v55 }
 0x87a   :  { %1953 = vmatpush3.xpose.msk.msra.mxu0 %vm882_vm6, %v1314_v58 }
 0x87b   :  { %1954 = vmatprep.subr.msk.mxu0 %vm882_vm6, %v1329_v37 }
 0x87e   :  { %1955 = vmatpush3.xpose.msk.msra.mxu0 %vm882_vm6, %v1313_v62 }
 0x87f   :  { %1956 = vmatprep.subr.msk.mxu0 %vm882_vm6, %v1328_v63 }
 0x882   :  { %1957 = vmatpush3.xpose.msk.msra.mxu0 %vm882_vm6, %v1312_v1 }
 0x883   :  { %1958 = vmatprep.subr.msk.mxu0 %vm882_vm6, %v1327_v2 }
 0x886   :  { %1959 = vmatpush3.xpose.msk.msra.mxu0 %vm882_vm6, %v1311_v5 }
 0x887   :  { %1960 = vmatprep.subr.msk.mxu0 %vm882_vm6, %v1326_v6 }
 0x88a   :  { %1961 = vmatpush3.xpose.msk.msra.mxu0 %vm882_vm6, %v1310_v8 }
 0x88b   :  { %1962 = vmatprep.subr.msk.mxu0 %vm882_vm6, %v1325_v9 }
 0x8cc   :  { %v1291_v32 = vpop.permute.xlu1 %1290 }
 0x8cd   :  { %v1293_v34 = vmul.f32 %v1291_v32, %v1261_v13  ;;  %v1309_v13 = vld [vmem:[%s3052_s8 + $0x8] sm:$0xff]  ;;  %s2222_s8 = smov [#allocation4]  }
 0x8ce   :  { %1963 = vmatpush3.xpose.msk.msra.mxu0 %vm882_vm6, %v1309_v13  ;;  %s1669_s16 = sshll.u32 %s2222_s8, 4  ;;  %s1670_s16 = int_to_ptr.vmem [resolvable:$true] %s1669_s16 }
 0x8cf   :  { %1295 = vrot.lane.b32.xlu0 %v1293_v34, %s2221_s22  ;;  %1964 = vmatprep.subr.msk.mxu0 %vm882_vm6, %v1324_v15  ;;  %s2172_s5 = scalar_lea.vmem %s1670_s16, 64  ;;  %p2177_p1 = scmp.lt.s32.totalorder %s1670_s16, %s1670_s16 }
 0x8d0   :  { %v1286_v3 = vpop.permute.xlu1 %1285  ;;  %p2173_p0 = scmp.ne.s32.totalorder %s1670_s16, %s2172_s5  ;;  %p2178_p2 = scmp.lt.s32.totalorder %s2172_s5, %s2172_s5 }
 0x8d1   :  { %v1288_v23 = vmul.f32 %v1286_v3, %v2802_v59 }
 0x8d2   :  { %1965 = vmatpush3.xpose.msk.msra.mxu0 %vm882_vm6, %v1308_v18  ;;  %p2179_p3 = por %p2178_p2, %p2177_p1 }
 0x8d4   :  { %p2180_p4 = pnand %p2179_p3, %p2173_p0 }
 0x941   :  { %v1296_v19 = vpop.permute.xlu0 %1295 }
 0x942   :  { %v1298_v20 = vsub.f32 %v2762_v60, %v1296_v19 }
 0x944   :  { %v1302_v21 = vrot.slane %v1298_v20, %v2721_v17 }
 0x946   :  { %1304 = vrot.lane.b32.xlu1 %v1302_v21, %s2221_s22 }
 0x9b8   :  { %v1305_v24 = vpop.permute.xlu1 %1304 }
 0x9b9   :  { %v1307_v25 = vadd.f32 %v1305_v24, %v1288_v23 }
 0x9bb   :  { %1966 = vmatprep.mubr.msk.f32.mxu0 %vm882_vm6, %v1307_v25  ;;  %2150 = vmatmul.mubr.msk.f32.vlgmr.msra.gmra.mxu1 %vm882_vm6, %v1307_v25 }
 0x9bc   :  { %1967 = vmatmul.mubr.msk.f32.vlgmr.msra.gmra.mxu0 %vm882_vm6, %v1307_v25 }
 0x9bd   :  { %2183 = shalt.err (!%p2180_p4)
}
 0x9be   :  { %1672 = dma.vmem_to_hbm [thread:$0]  %s1670_s16, 64, %s3057_s13, [#allocation5]   ;;  %v108_v60 = vsub.s32 2, %v2715_v14  ;;  %v96_v59 = vld [vmem:[%s3054_s10] sm:$0x7]  ;;  %v104_v26 = vsub.s32 1, %v2715_v14 }
 0x9bf   :  { %v101_v28 = vrot.slane %v96_v59, %v2721_v17  ;;  %s2223_s13 = smov [#allocation2]  }
 0x9c0   :  { %v109_v27 = vrot.slane %v96_v59, %v108_v60  ;;  %v105_v57 = vrot.slane %v96_v59, %v104_v26  ;;  %s1659_s10 = sshll.u32 %s2223_s13, 4  ;;  %s1660_s10 = int_to_ptr.vmem [resolvable:$true] %s1659_s10 }
 0x9c1   :  { %v328_v33 = vadd.f32 %v2641_v10, %v101_v28  ;;  %s2192_s20 = scalar_lea.vmem %s1660_s10, 192  ;;  %p2197_p6 = scmp.lt.s32.totalorder %s1660_s10, %s1660_s10 }
 0x9c2   :  { %v399_v29 = vadd.f32 %v2655_v22, %v109_v27  ;;  %v330_v34 = vadd.f32 %v2643_v11, %v105_v57  ;;  %p2193_p5 = scmp.ne.s32.totalorder %s1660_s10, %s2192_s20  ;;  %p2198_p7 = scmp.lt.s32.totalorder %s2192_s20, %s2192_s20 }
 0x9c4   :  { %p2199_p8 = por %p2198_p7, %p2197_p6 }
 0x9c6   :  { %p2200_p9 = pnand %p2199_p8, %p2193_p5 }
 0xa7b   :  { %v1640_v30 = vpop.f32.mrf.mxu1 }
 0xa7c   :  { %v1646_v31 = vadd.f32 %v1640_v30, %v399_v29  ;;  %v1569_v32 = vpop.f32.mrf.mxu0 }
 0xa7d   :  { %v2151_v35 = vpop.f32.mrf.mxu1  ;;  %v1644_v38 = vadd.f32 %v1569_v32, %v328_v33 }
 0xa7e   :  { %1652 = vst [vmem:[#allocation2 + $0x8] sm:$0xf] %v1646_v31  ;;  %v1571_v36 = vpop.f32.mrf.mxu0 }
 0xa7f   :  { %v1645_v14 = vadd.f32 %v1571_v36, %v330_v34 }
 0xa81   :  { %v1649_v39 = vcombine.low %v1644_v38, %v1645_v14 }
 0xa83   :  { %1651 = vst [vmem:[#allocation2] sm:$0xff] %v1649_v39 }
 0xa84   :  { %2203 = shalt.err (!%p2200_p9)
}
 0xa85   :  { %1662 = dma.vmem_to_hbm [thread:$0]  %s1660_s10, 192, %s3056_s12, [#allocation3]  }
 0xa86   :  { %2212 = dma.done.wait [#allocation3], 192  }
 0xa87   :  { %2213 = vsyncadd [#allocation3], 4294967104 }
 0xa88   :  { %2214 = dma.done.wait [#allocation5], 64  }
 0xa89   :  { %2215 = vsyncadd [#allocation5], 4294967232 }
 0xa8a   :  { %1679 = vsyncpa [#allocation3], 1 }
 0xa8b   :  { %1680 = vsyncpa [#allocation5], 1 }

</bundles_post_ra>
